<compile_context>
chip_gen: v7x
topology: tpu7x:2x2x1
jax: 0.10.0
libtpu: 0.0.40
codegen_flags: <defaults>
</compile_context>

<pallas_src>
import functools
import math

import jax
import jax.numpy as jnp
import numpy as np
from jax.experimental import pallas as pl
from jax.experimental.pallas import tpu as pltpu


def _round_up(x, m):
    return ((x + m - 1) // m) * m


def _vmem_capacity_bytes():
    try:
        return int(pltpu.get_tpu_info().vmem_capacity_bytes)
    except Exception:
        return 64 << 20  # conservative (v7x-sized) fallback


def _pick_time_chunk(T, Bp, D, Hp, itm_x, fixed_bytes, budget_bytes):
    """Largest divisor of T whose streamed blocks + chunk scratch fit the VMEM budget."""
    best = 1
    for tt in range(1, T + 1):
        if T % tt:
            continue
        stream = 2 * tt * Bp * D * itm_x + 2 * tt * Bp * Hp * 4   # x (2-buf) + out (2-buf)
        scratch = tt * Bp * 4 * Hp * 4                            # chunk input projection
        if fixed_bytes + stream + scratch + (2 << 20) <= budget_bytes:
            best = tt
    return best


def _pad_gate_cols(w, H, Hp):
    """(rows, 4H) -> (rows, 4*Hp): gate g occupies lane-aligned cols [g*Hp, g*Hp+H)."""
    rows = w.shape[0]
    w4 = w.reshape(rows, 4, H)
    w4 = jnp.pad(w4, ((0, 0), (0, 0), (0, Hp - H)))
    return w4.reshape(rows, 4 * Hp)


def _prepare_weights(cells, H, Hp, mm_dtype):
    """Stack per-direction, gate-padded, pre-transposed weights: (ndir, D, 4Hp) etc."""
    wihs, whhs, biases = [], [], []
    for (w_ih, w_hh, b_ih, b_hh) in cells:
        wih_p = _pad_gate_cols(jnp.asarray(w_ih, jnp.float32).T, H, Hp)       # (D, 4Hp)
        whh_p = _pad_gate_cols(jnp.asarray(w_hh, jnp.float32).T, H, Hp)       # (H, 4Hp)
        whh_p = jnp.pad(whh_p, ((0, Hp - H), (0, 0)))                         # (Hp, 4Hp)
        bias = jnp.asarray(b_ih, jnp.float32) + jnp.asarray(b_hh, jnp.float32)
        bias = jnp.pad(bias.reshape(4, H), ((0, 0), (0, Hp - H))).reshape(1, 4 * Hp)
        wihs.append(wih_p.astype(mm_dtype))
        whhs.append(whh_p.astype(mm_dtype))
        biases.append(bias)
    return jnp.stack(wihs), jnp.stack(whhs), jnp.stack(biases)


def _lstm_chunk_kernel(x_ref, wih_hbm, whh_hbm, b_hbm, o_ref,
                       wih_s, whh_s, b_s, h_scr, c_scr, gx_scr, dma_sem,
                       *, chunk, batch, hp, bidir):
    """Grid = (direction, time-chunk). One grid step = `chunk` LSTM time steps.

    x_ref:   (chunk*batch, D)       input slab (matmul dtype), via BlockSpec pipeline
    wih/whh/b_hbm: ANY-space HBM refs, shapes (ndir, D, 4hp) / (ndir, hp, 4hp) / (ndir, 1, 4hp)
    o_ref:   (chunk, batch, hp)     this direction's output half for this time chunk
    wih_s/whh_s/b_s: single-buffered VMEM copies of the current direction's weights
    h_scr, c_scr: (batch, hp)       recurrent state, persists across time chunks
    gx_scr:  (chunk*batch, 4hp) f32 chunk-level input projection
    """
    d = pl.program_id(0)
    ci = pl.program_id(1)

    @pl.when(ci == 0)
    def _():
        # Load this direction's weights ONCE into single-buffered VMEM scratch
        # (cheaper than letting the pipeline double-buffer an invariant operand)
        # and reset the recurrent state.
        cps = (pltpu.make_async_copy(wih_hbm.at[d], wih_s, dma_sem.at[0]),
               pltpu.make_async_copy(whh_hbm.at[d], whh_s, dma_sem.at[1]),
               pltpu.make_async_copy(b_hbm.at[d], b_s, dma_sem.at[2]))
        for cp in cps:
            cp.start()
        h_scr[...] = jnp.zeros_like(h_scr)
        c_scr[...] = jnp.zeros_like(c_scr)
        for cp in cps:
            cp.wait()

    mm_dtype = wih_s.dtype

    # ---- chunk-level input projection (no serial dependency): one tall MXU
    # matmul with the bias folded in, hoisted off the per-step critical path.
    gx_scr[...] = (
        jnp.dot(x_ref[...], wih_s[...], preferred_element_type=jnp.float32)
        + b_s[...])

    # ---- serial recurrence: only h @ W_hh + gate math per step. `chunk` is a
    # small static int -> full unroll. Direction 1 walks the chunk back-to-front.
    h = h_scr[...]
    c = c_scr[...]
    for s in range(chunk):
        if bidir:
            loc = s + d * (chunk - 1 - 2 * s)          # s (fwd) / chunk-1-s (bwd)
            row = pl.multiple_of(loc * batch, batch)   # aligned sublane offset
        else:
            loc = s
            row = s * batch
        gates = gx_scr[pl.ds(row, batch), :] + jnp.dot(
            h.astype(mm_dtype), whh_s[...], preferred_element_type=jnp.float32)
        # hp is a multiple of 128 -> each gate slice is whole 128-lane tiles.
        # sigmoid(x) == 0.5*tanh(0.5*x) + 0.5 exactly -> 1 EUP push per gate.
        i_g = 0.5 * jnp.tanh(0.5 * gates[:, 0 * hp:1 * hp]) + 0.5
        f_g = 0.5 * jnp.tanh(0.5 * gates[:, 1 * hp:2 * hp]) + 0.5
        g_g = jnp.tanh(gates[:, 2 * hp:3 * hp])
        o_g = 0.5 * jnp.tanh(0.5 * gates[:, 3 * hp:4 * hp]) + 0.5
        c = f_g * c + i_g * g_g
        h = o_g * jnp.tanh(c)
        o_ref[loc] = h.astype(o_ref.dtype)             # lane-dense (batch, hp) store

    h_scr[...] = h
    c_scr[...] = c


def lstm_forward_pallas(x, cells, *, matmul_dtype=jnp.bfloat16, time_chunk=None):
    """Run 1 (forward) or 2 (forward + reverse) LSTM recurrences in ONE pallas_call.

    x: (T, B, D) float32.
    cells: list of (w_ih (4H,D), w_hh (4H,H), b_ih (4H,), b_hh (4H,)); cells[1]
           (if present) is the reverse-time direction.
    Returns (T, B, len(cells)*H) float32, concatenated [forward | backward].
    """
    T, B, D = x.shape
    ndir = len(cells)
    H = cells[0][1].shape[1]
    Hp = _round_up(H, 128)                      # lane-aligned hidden width
    Bp = _round_up(B, 8)                        # sublane-aligned batch
    mm_dtype = jnp.dtype(matmul_dtype)
    itm = mm_dtype.itemsize

    wih_all, whh_all, b_all = _prepare_weights(cells, H, Hp, mm_dtype)

    # Single x conversion shared by both directions.
    xp = x if Bp == B else jnp.pad(x, ((0, 0), (0, Bp - B), (0, 0)))
    x2 = xp.reshape(T * Bp, D).astype(mm_dtype)

    # --- per-generation VMEM budgeting ---------------------------------------
    capacity = _vmem_capacity_bytes()
    budget = min(capacity - (8 << 20), 100 << 20)
    fixed = (D + Hp) * 4 * Hp * itm + 4 * Hp * 4 + 2 * Bp * Hp * 4   # weights+bias+state
    if time_chunk is None:
        TT = _pick_time_chunk(T, Bp, D, Hp, itm, fixed, budget)
    else:
        TT = int(time_chunk)
    assert T % TT == 0, "time_chunk must divide T"
    nc = T // TT

    need = (fixed + 2 * TT * Bp * D * itm + 2 * TT * Bp * Hp * 4
            + TT * Bp * 4 * Hp * 4 + (2 << 20))
    # Always explicit (v5e default scoped limit is only 16 MiB), clamped to the
    # chip's real capacity (64 MiB on v7x).
    vmem_limit = int(min(max(need, 16 << 20), capacity - (2 << 20)))

    if ndir == 2:
        x_map = lambda d, ci: (ci + d * (nc - 1 - 2 * ci), 0)          # fwd: ci, bwd: nc-1-ci
        o_map = lambda d, ci: (ci + d * (nc - 1 - 2 * ci), 0, d)       # each dir -> its Hp half
    else:
        x_map = lambda d, ci: (ci, 0)
        o_map = lambda d, ci: (ci, 0, 0)

    cost = pl.CostEstimate(
        flops=ndir * 2 * T * Bp * 4 * Hp * (D + Hp),
        transcendentals=ndir * 5 * T * Bp * Hp,
        bytes_accessed=(ndir * T * Bp * D * itm
                        + ndir * ((D + Hp) * 4 * Hp * itm + 4 * Hp * 4)
                        + T * Bp * ndir * Hp * 4),
    )

    kernel = functools.partial(_lstm_chunk_kernel, chunk=TT, batch=Bp, hp=Hp,
                               bidir=(ndir == 2))

    out = pl.pallas_call(
        kernel,
        out_shape=jax.ShapeDtypeStruct((T, Bp, ndir * Hp), jnp.float32),
        grid_spec=pltpu.PrefetchScalarGridSpec(
            num_scalar_prefetch=0,
            grid=(ndir, nc),
            in_specs=[
                pl.BlockSpec((TT * Bp, D), x_map),
                pl.BlockSpec(memory_space=pl.ANY),   # (ndir, D, 4Hp)  weights live in HBM,
                pl.BlockSpec(memory_space=pl.ANY),   # (ndir, Hp, 4Hp) copied once/direction
                pl.BlockSpec(memory_space=pl.ANY),   # (ndir, 1, 4Hp)  into 1-buffer scratch
            ],
            out_specs=pl.BlockSpec((TT, Bp, Hp), o_map),
            scratch_shapes=[
                pltpu.VMEM((D, 4 * Hp), mm_dtype),          # W_ih^T  (single buffer)
                pltpu.VMEM((Hp, 4 * Hp), mm_dtype),         # W_hh^T  (single buffer)
                pltpu.VMEM((1, 4 * Hp), jnp.float32),       # b_ih + b_hh
                pltpu.VMEM((Bp, Hp), jnp.float32),          # h state
                pltpu.VMEM((Bp, Hp), jnp.float32),          # c state
                pltpu.VMEM((TT * Bp, 4 * Hp), jnp.float32),  # chunk input projection
                pltpu.SemaphoreType.DMA((3,)),
            ],
        ),
        compiler_params=pltpu.CompilerParams(
            # Direction axis is independent -> megacore; time axis is a recurrence.
            dimension_semantics=("parallel", "arbitrary"),
            vmem_limit_bytes=vmem_limit,
        ),
        cost_estimate=cost,
    )(x2, wih_all, whh_all, b_all)

    if Hp == H and Bp == B:
        return out                                  # no post-kernel slice / concat needed
    if ndir == 1:
        return out[:, :B, :H]
    return jnp.concatenate([out[:, :B, :H], out[:, :B, Hp:Hp + H]], axis=-1)


class RNNPallas:
    """JAX/Pallas port of the PyTorch `RNN` module (cell_type='lstm', 'batch' mode)."""

    def __init__(self, input_dim, out_dim, cell_type="lstm", bi_dir=False,
                 key=None, matmul_dtype=jnp.bfloat16):
        assert cell_type == "lstm", "only the LSTM cell is implemented"
        self.input_dim = input_dim
        self.out_dim = out_dim
        self.bi_dir = bi_dir
        self.matmul_dtype = matmul_dtype
        hidden_dim = out_dim // 2 if bi_dir else out_dim
        self.hidden_dim = hidden_dim

        key = jax.random.PRNGKey(0) if key is None else key
        k = 1.0 / math.sqrt(hidden_dim)

        def init_cell(key):
            ks = jax.random.split(key, 4)
            w_ih = jax.random.uniform(ks[0], (4 * hidden_dim, input_dim),
                                      jnp.float32, -k, k)
            w_hh = jax.random.uniform(ks[1], (4 * hidden_dim, hidden_dim),
                                      jnp.float32, -k, k)
            b_ih = jax.random.uniform(ks[2], (4 * hidden_dim,), jnp.float32, -k, k)
            b_hh = jax.random.uniform(ks[3], (4 * hidden_dim,), jnp.float32, -k, k)
            return w_ih, w_hh, b_ih, b_hh

        kf, kb = jax.random.split(key)
        self.params_f = init_cell(kf)
        self.params_b = init_cell(kb) if bi_dir else None

    def __call__(self, x):
        """x: (T, B, input_dim) -> (T, B, out_dim)."""
        cells = [self.params_f] + ([self.params_b] if self.bi_dir else [])
        return lstm_forward_pallas(x, cells, matmul_dtype=self.matmul_dtype)


# ---- pure-NumPy float64 reference (backend-independent correctness check) ----
def _lstm_ref_np(x, w_ih, w_hh, b_ih, b_hh, reverse=False):
    x = np.asarray(x, np.float64)
    w_ih = np.asarray(w_ih, np.float64)
    w_hh = np.asarray(w_hh, np.float64)
    b = np.asarray(b_ih, np.float64) + np.asarray(b_hh, np.float64)
    T, B, _ = x.shape
    H = w_hh.shape[1]
    h = np.zeros((B, H))
    c = np.zeros((B, H))
    out = np.zeros((T, B, H))
    sig = lambda v: 1.0 / (1.0 + np.exp(-v))
    order = range(T - 1, -1, -1) if reverse else range(T)
    for t in order:
        g = x[t] @ w_ih.T + h @ w_hh.T + b
        i, f, gg, o = g[:, :H], g[:, H:2 * H], g[:, 2 * H:3 * H], g[:, 3 * H:]
        c = sig(f) * c + sig(i) * np.tanh(gg)
        h = sig(o) * np.tanh(c)
        out[t] = h
    return out


if __name__ == "__main__":
    T, B, INPUT_DIM, OUT_DIM = 8, 8, 16, 32

    key = jax.random.PRNGKey(0)
    kx, kp = jax.random.split(key)
    x = jax.random.normal(kx, (T, B, INPUT_DIM), jnp.float32)
    x_np = np.asarray(x)

    # --- unidirectional, f32 MXU operands (tight check) ---
    model = RNNPallas(INPUT_DIM, OUT_DIM, bi_dir=False, key=kp,
                      matmul_dtype=jnp.float32)
    out = jax.block_until_ready(model(x))
    assert out.shape == (T, B, OUT_DIM), out.shape
    ref = _lstm_ref_np(x_np, *[np.asarray(p) for p in model.params_f])
    err = float(np.max(np.abs(np.asarray(out, np.float64) - ref)))
    assert err < 2e-3, f"f32 unidirectional max err {err}"

    # --- unidirectional, default bf16 MXU operands (f32 state/gates): loose check ---
    model_bf = RNNPallas(INPUT_DIM, OUT_DIM, bi_dir=False, key=kp)  # bf16 default
    out_bf = jax.block_until_ready(model_bf(x))
    err_bf = float(np.max(np.abs(np.asarray(out_bf, np.float64) - ref)))
    assert err_bf < 1e-1, f"bf16 unidirectional max err {err_bf}"

    # --- bidirectional: fwd + bwd fused into ONE pallas_call (f32 operands) ---
    model_bd = RNNPallas(INPUT_DIM, OUT_DIM, bi_dir=True, key=kp,
                         matmul_dtype=jnp.float32)
    out_bd = jax.block_until_ready(model_bd(x))
    assert out_bd.shape == (T, B, OUT_DIM), out_bd.shape
    pf = [np.asarray(p) for p in model_bd.params_f]
    pb = [np.asarray(p) for p in model_bd.params_b]
    ref_bd = np.concatenate(
        [_lstm_ref_np(x_np, *pf), _lstm_ref_np(x_np, *pb, reverse=True)], axis=-1)
    err_bd = float(np.max(np.abs(np.asarray(out_bd, np.float64) - ref_bd)))
    assert err_bd < 2e-3, f"f32 bidirectional max err {err_bd}"

    print("KERNEL_OK")
</pallas_src>

<mosaic_0001>
module attributes {stable_mosaic.version = 11 : i64} {
  func.func @_lstm_chunk_kernel(%arg0: i32, %arg1: i32, %arg2: memref<64x16xf32, #tpu.memory_space<vmem>>, %arg3: memref<1x16x512xf32, #tpu.memory_space<any>>, %arg4: memref<1x128x512xf32, #tpu.memory_space<any>>, %arg5: memref<1x1x512xf32, #tpu.memory_space<any>>, %arg6: memref<8x8x128xf32, #tpu.memory_space<vmem>>, %arg7: memref<16x512xf32, #tpu.memory_space<vmem>>, %arg8: memref<128x512xf32, #tpu.memory_space<vmem>>, %arg9: memref<1x512xf32, #tpu.memory_space<vmem>>, %arg10: memref<8x128xf32, #tpu.memory_space<vmem>>, %arg11: memref<8x128xf32, #tpu.memory_space<vmem>>, %arg12: memref<64x512xf32, #tpu.memory_space<vmem>>, %arg13: memref<3x!tpu.dma_semaphore, #tpu.memory_space<semaphore_mem>>) attributes {dimension_semantics = [#tpu.dimension_semantics<parallel>, #tpu.dimension_semantics<arbitrary>], iteration_bounds = array<i64: 1, 1>, scalar_prefetch = 0 : i64, scratch_operands = 7 : i64, tpu.core_type = #tpu.core_type<tc>, window_params = [{transform_indices = @transform_0, window_bounds = array<i64: 64, 16>}, {}, {}, {}, {transform_indices = @transform_4, window_bounds = array<i64: 8, 8, 128>}]} {
    %c0_i32 = arith.constant 0 : i32
    %0 = arith.cmpi eq, %arg1, %c0_i32 : i32
    %1 = arith.extui %0 : i1 to i32
    %c0_i32_0 = arith.constant 0 : i32
    %2 = arith.cmpi ne, %1, %c0_i32_0 : i32
    scf.if %2 {
      %c0_i32_138 = arith.constant 0 : i32
      %c0_i32_139 = arith.constant 0 : i32
      %c0_i32_140 = arith.constant 0 : i32
      %318 = tpu.memref_slice %arg3[%arg0, %c0_i32_139, %c0_i32_140] : memref<1x16x512xf32, #tpu.memory_space<any>> -> memref<1x16x512xf32, #tpu.memory_space<any>>
      %319 = tpu.memref_squeeze %318 : memref<1x16x512xf32, #tpu.memory_space<any>> -> memref<16x512xf32, #tpu.memory_space<any>>
      %320 = tpu.memref_slice %arg13[%c0_i32_138] : memref<3x!tpu.dma_semaphore, #tpu.memory_space<semaphore_mem>> -> memref<1x!tpu.dma_semaphore, #tpu.memory_space<semaphore_mem>>
      %321 = tpu.memref_squeeze %320 : memref<1x!tpu.dma_semaphore, #tpu.memory_space<semaphore_mem>> -> memref<!tpu.dma_semaphore, #tpu.memory_space<semaphore_mem>>
      tpu.enqueue_dma source(%319 : memref<16x512xf32, #tpu.memory_space<any>>) target(%arg7 : memref<16x512xf32, #tpu.memory_space<vmem>>) target_semaphore(%321 : memref<!tpu.dma_semaphore, #tpu.memory_space<semaphore_mem>>)
      %c1_i32 = arith.constant 1 : i32
      %c0_i32_141 = arith.constant 0 : i32
      %c0_i32_142 = arith.constant 0 : i32
      %322 = tpu.memref_slice %arg4[%arg0, %c0_i32_141, %c0_i32_142] : memref<1x128x512xf32, #tpu.memory_space<any>> -> memref<1x128x512xf32, #tpu.memory_space<any>>
      %323 = tpu.memref_squeeze %322 : memref<1x128x512xf32, #tpu.memory_space<any>> -> memref<128x512xf32, #tpu.memory_space<any>>
      %324 = tpu.memref_slice %arg13[%c1_i32] : memref<3x!tpu.dma_semaphore, #tpu.memory_space<semaphore_mem>> -> memref<1x!tpu.dma_semaphore, #tpu.memory_space<semaphore_mem>>
      %325 = tpu.memref_squeeze %324 : memref<1x!tpu.dma_semaphore, #tpu.memory_space<semaphore_mem>> -> memref<!tpu.dma_semaphore, #tpu.memory_space<semaphore_mem>>
      tpu.enqueue_dma source(%323 : memref<128x512xf32, #tpu.memory_space<any>>) target(%arg8 : memref<128x512xf32, #tpu.memory_space<vmem>>) target_semaphore(%325 : memref<!tpu.dma_semaphore, #tpu.memory_space<semaphore_mem>>)
      %c2_i32 = arith.constant 2 : i32
      %c0_i32_143 = arith.constant 0 : i32
      %c0_i32_144 = arith.constant 0 : i32
      %326 = tpu.memref_slice %arg5[%arg0, %c0_i32_143, %c0_i32_144] : memref<1x1x512xf32, #tpu.memory_space<any>> -> memref<1x1x512xf32, #tpu.memory_space<any>>
      %327 = tpu.memref_squeeze %326 : memref<1x1x512xf32, #tpu.memory_space<any>> -> memref<1x512xf32, #tpu.memory_space<any>>
      %328 = tpu.memref_slice %arg13[%c2_i32] : memref<3x!tpu.dma_semaphore, #tpu.memory_space<semaphore_mem>> -> memref<1x!tpu.dma_semaphore, #tpu.memory_space<semaphore_mem>>
      %329 = tpu.memref_squeeze %328 : memref<1x!tpu.dma_semaphore, #tpu.memory_space<semaphore_mem>> -> memref<!tpu.dma_semaphore, #tpu.memory_space<semaphore_mem>>
      tpu.enqueue_dma source(%327 : memref<1x512xf32, #tpu.memory_space<any>>) target(%arg9 : memref<1x512xf32, #tpu.memory_space<vmem>>) target_semaphore(%329 : memref<!tpu.dma_semaphore, #tpu.memory_space<semaphore_mem>>)
      %cst_145 = arith.constant 0.000000e+00 : f32
      %330 = vector.broadcast %cst_145 : f32 to vector<8x128xf32>
      %c0_146 = arith.constant 0 : index
      %c0_147 = arith.constant 0 : index
      %331 = vector.load %arg10[%c0_146, %c0_147] : memref<8x128xf32, #tpu.memory_space<vmem>>, vector<8x128xf32>
      tpu.vector_store %arg10[%c0_146, %c0_147], %330 {strides = array<i32>} : memref<8x128xf32, #tpu.memory_space<vmem>>, vector<8x128xf32>,
      %cst_148 = arith.constant 0.000000e+00 : f32
      %332 = vector.broadcast %cst_148 : f32 to vector<8x128xf32>
      %c0_149 = arith.constant 0 : index
      %c0_150 = arith.constant 0 : index
      %333 = vector.load %arg11[%c0_149, %c0_150] : memref<8x128xf32, #tpu.memory_space<vmem>>, vector<8x128xf32>
      tpu.vector_store %arg11[%c0_149, %c0_150], %332 {strides = array<i32>} : memref<8x128xf32, #tpu.memory_space<vmem>>, vector<8x128xf32>,
      %c0_i32_151 = arith.constant 0 : i32
      %c0_i32_152 = arith.constant 0 : i32
      %c0_i32_153 = arith.constant 0 : i32
      %334 = tpu.memref_slice %arg3[%arg0, %c0_i32_152, %c0_i32_153] : memref<1x16x512xf32, #tpu.memory_space<any>> -> memref<1x16x512xf32, #tpu.memory_space<any>>
      %335 = tpu.memref_squeeze %334 : memref<1x16x512xf32, #tpu.memory_space<any>> -> memref<16x512xf32, #tpu.memory_space<any>>
      %336 = tpu.memref_slice %arg13[%c0_i32_151] : memref<3x!tpu.dma_semaphore, #tpu.memory_space<semaphore_mem>> -> memref<1x!tpu.dma_semaphore, #tpu.memory_space<semaphore_mem>>
      %337 = tpu.memref_squeeze %336 : memref<1x!tpu.dma_semaphore, #tpu.memory_space<semaphore_mem>> -> memref<!tpu.dma_semaphore, #tpu.memory_space<semaphore_mem>>
      tpu.wait_dma2 semaphore(%337 : memref<!tpu.dma_semaphore, #tpu.memory_space<semaphore_mem>>) src(%335 : memref<16x512xf32, #tpu.memory_space<any>>) dst(%arg7 : memref<16x512xf32, #tpu.memory_space<vmem>>)
      %c1_i32_154 = arith.constant 1 : i32
      %c0_i32_155 = arith.constant 0 : i32
      %c0_i32_156 = arith.constant 0 : i32
      %338 = tpu.memref_slice %arg4[%arg0, %c0_i32_155, %c0_i32_156] : memref<1x128x512xf32, #tpu.memory_space<any>> -> memref<1x128x512xf32, #tpu.memory_space<any>>
      %339 = tpu.memref_squeeze %338 : memref<1x128x512xf32, #tpu.memory_space<any>> -> memref<128x512xf32, #tpu.memory_space<any>>
      %340 = tpu.memref_slice %arg13[%c1_i32_154] : memref<3x!tpu.dma_semaphore, #tpu.memory_space<semaphore_mem>> -> memref<1x!tpu.dma_semaphore, #tpu.memory_space<semaphore_mem>>
      %341 = tpu.memref_squeeze %340 : memref<1x!tpu.dma_semaphore, #tpu.memory_space<semaphore_mem>> -> memref<!tpu.dma_semaphore, #tpu.memory_space<semaphore_mem>>
      tpu.wait_dma2 semaphore(%341 : memref<!tpu.dma_semaphore, #tpu.memory_space<semaphore_mem>>) src(%339 : memref<128x512xf32, #tpu.memory_space<any>>) dst(%arg8 : memref<128x512xf32, #tpu.memory_space<vmem>>)
      %c2_i32_157 = arith.constant 2 : i32
      %c0_i32_158 = arith.constant 0 : i32
      %c0_i32_159 = arith.constant 0 : i32
      %342 = tpu.memref_slice %arg5[%arg0, %c0_i32_158, %c0_i32_159] : memref<1x1x512xf32, #tpu.memory_space<any>> -> memref<1x1x512xf32, #tpu.memory_space<any>>
      %343 = tpu.memref_squeeze %342 : memref<1x1x512xf32, #tpu.memory_space<any>> -> memref<1x512xf32, #tpu.memory_space<any>>
      %344 = tpu.memref_slice %arg13[%c2_i32_157] : memref<3x!tpu.dma_semaphore, #tpu.memory_space<semaphore_mem>> -> memref<1x!tpu.dma_semaphore, #tpu.memory_space<semaphore_mem>>
      %345 = tpu.memref_squeeze %344 : memref<1x!tpu.dma_semaphore, #tpu.memory_space<semaphore_mem>> -> memref<!tpu.dma_semaphore, #tpu.memory_space<semaphore_mem>>
      tpu.wait_dma2 semaphore(%345 : memref<!tpu.dma_semaphore, #tpu.memory_space<semaphore_mem>>) src(%343 : memref<1x512xf32, #tpu.memory_space<any>>) dst(%arg9 : memref<1x512xf32, #tpu.memory_space<vmem>>)
    } else {
    }
    %c0 = arith.constant 0 : index
    %c0_1 = arith.constant 0 : index
    %3 = vector.load %arg2[%c0, %c0_1] : memref<64x16xf32, #tpu.memory_space<vmem>>, vector<64x16xf32>
    %c0_2 = arith.constant 0 : index
    %c0_3 = arith.constant 0 : index
    %4 = vector.load %arg7[%c0_2, %c0_3] : memref<16x512xf32, #tpu.memory_space<vmem>>, vector<16x512xf32>
    %cst = arith.constant dense<0.000000e+00> : vector<64x512xf32>
    %5 = tpu.matmul %3, %4, %cst {dimension_numbers = #tpu.dot_dimension_numbers<[1], [0], [0], [1], [0, 0, 1, 1], [], []>} : vector<64x16xf32>, vector<16x512xf32>, vector<64x512xf32> -> vector<64x512xf32>
    %c0_4 = arith.constant 0 : index
    %c0_5 = arith.constant 0 : index
    %6 = vector.load %arg9[%c0_4, %c0_5] : memref<1x512xf32, #tpu.memory_space<vmem>>, vector<1x512xf32>
    %7 = vector.broadcast %6 : vector<1x512xf32> to vector<64x512xf32>
    %8 = arith.addf %5, %7 : vector<64x512xf32>
    %c0_6 = arith.constant 0 : index
    %c0_7 = arith.constant 0 : index
    %9 = vector.load %arg12[%c0_6, %c0_7] : memref<64x512xf32, #tpu.memory_space<vmem>>, vector<64x512xf32>
    tpu.vector_store %arg12[%c0_6, %c0_7], %8 {strides = array<i32>} : memref<64x512xf32, #tpu.memory_space<vmem>>, vector<64x512xf32>,
    %c0_8 = arith.constant 0 : index
    %c0_9 = arith.constant 0 : index
    %10 = vector.load %arg10[%c0_8, %c0_9] : memref<8x128xf32, #tpu.memory_space<vmem>>, vector<8x128xf32>
    %c0_10 = arith.constant 0 : index
    %c0_11 = arith.constant 0 : index
    %11 = vector.load %arg11[%c0_10, %c0_11] : memref<8x128xf32, #tpu.memory_space<vmem>>, vector<8x128xf32>
    %c0_12 = arith.constant 0 : index
    %c0_13 = arith.constant 0 : index
    %12 = vector.load %arg12[%c0_12, %c0_13] : memref<64x512xf32, #tpu.memory_space<vmem>>, vector<8x512xf32>
    %c0_14 = arith.constant 0 : index
    %c0_15 = arith.constant 0 : index
    %13 = vector.load %arg8[%c0_14, %c0_15] : memref<128x512xf32, #tpu.memory_space<vmem>>, vector<128x512xf32>
    %cst_16 = arith.constant dense<0.000000e+00> : vector<8x512xf32>
    %14 = tpu.matmul %10, %13, %cst_16 {dimension_numbers = #tpu.dot_dimension_numbers<[1], [0], [0], [1], [0, 0, 1, 1], [], []>} : vector<8x128xf32>, vector<128x512xf32>, vector<8x512xf32> -> vector<8x512xf32>
    %15 = arith.addf %12, %14 : vector<8x512xf32>
    %16 = vector.extract_strided_slice %15 {offsets = [0, 0], sizes = [8, 128], strides = [1, 1]} : vector<8x512xf32> to vector<8x128xf32>
    %cst_17 = arith.constant 5.000000e-01 : f32
    %17 = vector.broadcast %cst_17 : f32 to vector<8x128xf32>
    %18 = arith.mulf %17, %16 : vector<8x128xf32>
    %19 = math.tanh %18 : vector<8x128xf32>
    %cst_18 = arith.constant 5.000000e-01 : f32
    %20 = vector.broadcast %cst_18 : f32 to vector<8x128xf32>
    %21 = arith.mulf %20, %19 : vector<8x128xf32>
    %cst_19 = arith.constant 5.000000e-01 : f32
    %22 = vector.broadcast %cst_19 : f32 to vector<8x128xf32>
    %23 = arith.addf %21, %22 : vector<8x128xf32>
    %24 = vector.extract_strided_slice %15 {offsets = [0, 128], sizes = [8, 128], strides = [1, 1]} : vector<8x512xf32> to vector<8x128xf32>
    %cst_20 = arith.constant 5.000000e-01 : f32
    %25 = vector.broadcast %cst_20 : f32 to vector<8x128xf32>
    %26 = arith.mulf %25, %24 : vector<8x128xf32>
    %27 = math.tanh %26 : vector<8x128xf32>
    %cst_21 = arith.constant 5.000000e-01 : f32
    %28 = vector.broadcast %cst_21 : f32 to vector<8x128xf32>
    %29 = arith.mulf %28, %27 : vector<8x128xf32>
    %cst_22 = arith.constant 5.000000e-01 : f32
    %30 = vector.broadcast %cst_22 : f32 to vector<8x128xf32>
    %31 = arith.addf %29, %30 : vector<8x128xf32>
    %32 = vector.extract_strided_slice %15 {offsets = [0, 256], sizes = [8, 128], strides = [1, 1]} : vector<8x512xf32> to vector<8x128xf32>
    %33 = math.tanh %32 : vector<8x128xf32>
    %34 = vector.extract_strided_slice %15 {offsets = [0, 384], sizes = [8, 128], strides = [1, 1]} : vector<8x512xf32> to vector<8x128xf32>
    %cst_23 = arith.constant 5.000000e-01 : f32
    %35 = vector.broadcast %cst_23 : f32 to vector<8x128xf32>
    %36 = arith.mulf %35, %34 : vector<8x128xf32>
    %37 = math.tanh %36 : vector<8x128xf32>
    %cst_24 = arith.constant 5.000000e-01 : f32
    %38 = vector.broadcast %cst_24 : f32 to vector<8x128xf32>
    %39 = arith.mulf %38, %37 : vector<8x128xf32>
    %cst_25 = arith.constant 5.000000e-01 : f32
    %40 = vector.broadcast %cst_25 : f32 to vector<8x128xf32>
    %41 = arith.addf %39, %40 : vector<8x128xf32>
    %42 = arith.mulf %31, %11 : vector<8x128xf32>
    %43 = arith.mulf %23, %33 : vector<8x128xf32>
    %44 = arith.addf %42, %43 : vector<8x128xf32>
    %45 = math.tanh %44 : vector<8x128xf32>
    %46 = arith.mulf %41, %45 : vector<8x128xf32>
    %c0_26 = arith.constant 0 : index
    %c0_27 = arith.constant 0 : index
    %c0_28 = arith.constant 0 : index
    %47 = vector.load %arg6[%c0_26, %c0_27, %c0_28] : memref<8x8x128xf32, #tpu.memory_space<vmem>>, vector<1x8x128xf32>
    %48 = vector.shape_cast %47 : vector<1x8x128xf32> to vector<8x128xf32>
    %49 = vector.shape_cast %46 : vector<8x128xf32> to vector<1x8x128xf32>
    tpu.vector_store %arg6[%c0_26, %c0_27, %c0_28], %49 {strides = array<i32>} : memref<8x8x128xf32, #tpu.memory_space<vmem>>, vector<1x8x128xf32>,
    %c8 = arith.constant 8 : index
    %c0_29 = arith.constant 0 : index
    %50 = vector.load %arg12[%c8, %c0_29] : memref<64x512xf32, #tpu.memory_space<vmem>>, vector<8x512xf32>
    %c0_30 = arith.constant 0 : index
    %c0_31 = arith.constant 0 : index
    %51 = vector.load %arg8[%c0_30, %c0_31] : memref<128x512xf32, #tpu.memory_space<vmem>>, vector<128x512xf32>
    %cst_32 = arith.constant dense<0.000000e+00> : vector<8x512xf32>
    %52 = tpu.matmul %46, %51, %cst_32 {dimension_numbers = #tpu.dot_dimension_numbers<[1], [0], [0], [1], [0, 0, 1, 1], [], []>} : vector<8x128xf32>, vector<128x512xf32>, vector<8x512xf32> -> vector<8x512xf32>
    %53 = arith.addf %50, %52 : vector<8x512xf32>
    %54 = vector.extract_strided_slice %53 {offsets = [0, 0], sizes = [8, 128], strides = [1, 1]} : vector<8x512xf32> to vector<8x128xf32>
    %cst_33 = arith.constant 5.000000e-01 : f32
    %55 = vector.broadcast %cst_33 : f32 to vector<8x128xf32>
    %56 = arith.mulf %55, %54 : vector<8x128xf32>
    %57 = math.tanh %56 : vector<8x128xf32>
    %cst_34 = arith.constant 5.000000e-01 : f32
    %58 = vector.broadcast %cst_34 : f32 to vector<8x128xf32>
    %59 = arith.mulf %58, %57 : vector<8x128xf32>
    %cst_35 = arith.constant 5.000000e-01 : f32
    %60 = vector.broadcast %cst_35 : f32 to vector<8x128xf32>
    %61 = arith.addf %59, %60 : vector<8x128xf32>
    %62 = vector.extract_strided_slice %53 {offsets = [0, 128], sizes = [8, 128], strides = [1, 1]} : vector<8x512xf32> to vector<8x128xf32>
    %cst_36 = arith.constant 5.000000e-01 : f32
    %63 = vector.broadcast %cst_36 : f32 to vector<8x128xf32>
    %64 = arith.mulf %63, %62 : vector<8x128xf32>
    %65 = math.tanh %64 : vector<8x128xf32>
    %cst_37 = arith.constant 5.000000e-01 : f32
    %66 = vector.broadcast %cst_37 : f32 to vector<8x128xf32>
    %67 = arith.mulf %66, %65 : vector<8x128xf32>
    %cst_38 = arith.constant 5.000000e-01 : f32
    %68 = vector.broadcast %cst_38 : f32 to vector<8x128xf32>
    %69 = arith.addf %67, %68 : vector<8x128xf32>
    %70 = vector.extract_strided_slice %53 {offsets = [0, 256], sizes = [8, 128], strides = [1, 1]} : vector<8x512xf32> to vector<8x128xf32>
    %71 = math.tanh %70 : vector<8x128xf32>
    %72 = vector.extract_strided_slice %53 {offsets = [0, 384], sizes = [8, 128], strides = [1, 1]} : vector<8x512xf32> to vector<8x128xf32>
    %cst_39 = arith.constant 5.000000e-01 : f32
    %73 = vector.broadcast %cst_39 : f32 to vector<8x128xf32>
    %74 = arith.mulf %73, %72 : vector<8x128xf32>
    %75 = math.tanh %74 : vector<8x128xf32>
    %cst_40 = arith.constant 5.000000e-01 : f32
    %76 = vector.broadcast %cst_40 : f32 to vector<8x128xf32>
    %77 = arith.mulf %76, %75 : vector<8x128xf32>
    %cst_41 = arith.constant 5.000000e-01 : f32
    %78 = vector.broadcast %cst_41 : f32 to vector<8x128xf32>
    %79 = arith.addf %77, %78 : vector<8x128xf32>
    %80 = arith.mulf %69, %44 : vector<8x128xf32>
    %81 = arith.mulf %61, %71 : vector<8x128xf32>
    %82 = arith.addf %80, %81 : vector<8x128xf32>
    %83 = math.tanh %82 : vector<8x128xf32>
    %84 = arith.mulf %79, %83 : vector<8x128xf32>
    %c1 = arith.constant 1 : index
    %c0_42 = arith.constant 0 : index
    %c0_43 = arith.constant 0 : index
    %85 = vector.load %arg6[%c1, %c0_42, %c0_43] : memref<8x8x128xf32, #tpu.memory_space<vmem>>, vector<1x8x128xf32>
    %86 = vector.shape_cast %85 : vector<1x8x128xf32> to vector<8x128xf32>
    %87 = vector.shape_cast %84 : vector<8x128xf32> to vector<1x8x128xf32>
    tpu.vector_store %arg6[%c1, %c0_42, %c0_43], %87 {strides = array<i32>} : memref<8x8x128xf32, #tpu.memory_space<vmem>>, vector<1x8x128xf32>,
    %c16 = arith.constant 16 : index
    %c0_44 = arith.constant 0 : index
    %88 = vector.load %arg12[%c16, %c0_44] : memref<64x512xf32, #tpu.memory_space<vmem>>, vector<8x512xf32>
    %c0_45 = arith.constant 0 : index
    %c0_46 = arith.constant 0 : index
    %89 = vector.load %arg8[%c0_45, %c0_46] : memref<128x512xf32, #tpu.memory_space<vmem>>, vector<128x512xf32>
    %cst_47 = arith.constant dense<0.000000e+00> : vector<8x512xf32>
    %90 = tpu.matmul %84, %89, %cst_47 {dimension_numbers = #tpu.dot_dimension_numbers<[1], [0], [0], [1], [0, 0, 1, 1], [], []>} : vector<8x128xf32>, vector<128x512xf32>, vector<8x512xf32> -> vector<8x512xf32>
    %91 = arith.addf %88, %90 : vector<8x512xf32>
    %92 = vector.extract_strided_slice %91 {offsets = [0, 0], sizes = [8, 128], strides = [1, 1]} : vector<8x512xf32> to vector<8x128xf32>
    %cst_48 = arith.constant 5.000000e-01 : f32
    %93 = vector.broadcast %cst_48 : f32 to vector<8x128xf32>
    %94 = arith.mulf %93, %92 : vector<8x128xf32>
    %95 = math.tanh %94 : vector<8x128xf32>
    %cst_49 = arith.constant 5.000000e-01 : f32
    %96 = vector.broadcast %cst_49 : f32 to vector<8x128xf32>
    %97 = arith.mulf %96, %95 : vector<8x128xf32>
    %cst_50 = arith.constant 5.000000e-01 : f32
    %98 = vector.broadcast %cst_50 : f32 to vector<8x128xf32>
    %99 = arith.addf %97, %98 : vector<8x128xf32>
    %100 = vector.extract_strided_slice %91 {offsets = [0, 128], sizes = [8, 128], strides = [1, 1]} : vector<8x512xf32> to vector<8x128xf32>
    %cst_51 = arith.constant 5.000000e-01 : f32
    %101 = vector.broadcast %cst_51 : f32 to vector<8x128xf32>
    %102 = arith.mulf %101, %100 : vector<8x128xf32>
    %103 = math.tanh %102 : vector<8x128xf32>
    %cst_52 = arith.constant 5.000000e-01 : f32
    %104 = vector.broadcast %cst_52 : f32 to vector<8x128xf32>
    %105 = arith.mulf %104, %103 : vector<8x128xf32>
    %cst_53 = arith.constant 5.000000e-01 : f32
    %106 = vector.broadcast %cst_53 : f32 to vector<8x128xf32>
    %107 = arith.addf %105, %106 : vector<8x128xf32>
    %108 = vector.extract_strided_slice %91 {offsets = [0, 256], sizes = [8, 128], strides = [1, 1]} : vector<8x512xf32> to vector<8x128xf32>
    %109 = math.tanh %108 : vector<8x128xf32>
    %110 = vector.extract_strided_slice %91 {offsets = [0, 384], sizes = [8, 128], strides = [1, 1]} : vector<8x512xf32> to vector<8x128xf32>
    %cst_54 = arith.constant 5.000000e-01 : f32
    %111 = vector.broadcast %cst_54 : f32 to vector<8x128xf32>
    %112 = arith.mulf %111, %110 : vector<8x128xf32>
    %113 = math.tanh %112 : vector<8x128xf32>
    %cst_55 = arith.constant 5.000000e-01 : f32
    %114 = vector.broadcast %cst_55 : f32 to vector<8x128xf32>
    %115 = arith.mulf %114, %113 : vector<8x128xf32>
    %cst_56 = arith.constant 5.000000e-01 : f32
    %116 = vector.broadcast %cst_56 : f32 to vector<8x128xf32>
    %117 = arith.addf %115, %116 : vector<8x128xf32>
    %118 = arith.mulf %107, %82 : vector<8x128xf32>
    %119 = arith.mulf %99, %109 : vector<8x128xf32>
    %120 = arith.addf %118, %119 : vector<8x128xf32>
    %121 = math.tanh %120 : vector<8x128xf32>
    %122 = arith.mulf %117, %121 : vector<8x128xf32>
    %c2 = arith.constant 2 : index
    %c0_57 = arith.constant 0 : index
    %c0_58 = arith.constant 0 : index
    %123 = vector.load %arg6[%c2, %c0_57, %c0_58] : memref<8x8x128xf32, #tpu.memory_space<vmem>>, vector<1x8x128xf32>
    %124 = vector.shape_cast %123 : vector<1x8x128xf32> to vector<8x128xf32>
    %125 = vector.shape_cast %122 : vector<8x128xf32> to vector<1x8x128xf32>
    tpu.vector_store %arg6[%c2, %c0_57, %c0_58], %125 {strides = array<i32>} : memref<8x8x128xf32, #tpu.memory_space<vmem>>, vector<1x8x128xf32>,
    %c24 = arith.constant 24 : index
    %c0_59 = arith.constant 0 : index
    %126 = vector.load %arg12[%c24, %c0_59] : memref<64x512xf32, #tpu.memory_space<vmem>>, vector<8x512xf32>
    %c0_60 = arith.constant 0 : index
    %c0_61 = arith.constant 0 : index
    %127 = vector.load %arg8[%c0_60, %c0_61] : memref<128x512xf32, #tpu.memory_space<vmem>>, vector<128x512xf32>
    %cst_62 = arith.constant dense<0.000000e+00> : vector<8x512xf32>
    %128 = tpu.matmul %122, %127, %cst_62 {dimension_numbers = #tpu.dot_dimension_numbers<[1], [0], [0], [1], [0, 0, 1, 1], [], []>} : vector<8x128xf32>, vector<128x512xf32>, vector<8x512xf32> -> vector<8x512xf32>
    %129 = arith.addf %126, %128 : vector<8x512xf32>
    %130 = vector.extract_strided_slice %129 {offsets = [0, 0], sizes = [8, 128], strides = [1, 1]} : vector<8x512xf32> to vector<8x128xf32>
    %cst_63 = arith.constant 5.000000e-01 : f32
    %131 = vector.broadcast %cst_63 : f32 to vector<8x128xf32>
    %132 = arith.mulf %131, %130 : vector<8x128xf32>
    %133 = math.tanh %132 : vector<8x128xf32>
    %cst_64 = arith.constant 5.000000e-01 : f32
    %134 = vector.broadcast %cst_64 : f32 to vector<8x128xf32>
    %135 = arith.mulf %134, %133 : vector<8x128xf32>
    %cst_65 = arith.constant 5.000000e-01 : f32
    %136 = vector.broadcast %cst_65 : f32 to vector<8x128xf32>
    %137 = arith.addf %135, %136 : vector<8x128xf32>
    %138 = vector.extract_strided_slice %129 {offsets = [0, 128], sizes = [8, 128], strides = [1, 1]} : vector<8x512xf32> to vector<8x128xf32>
    %cst_66 = arith.constant 5.000000e-01 : f32
    %139 = vector.broadcast %cst_66 : f32 to vector<8x128xf32>
    %140 = arith.mulf %139, %138 : vector<8x128xf32>
    %141 = math.tanh %140 : vector<8x128xf32>
    %cst_67 = arith.constant 5.000000e-01 : f32
    %142 = vector.broadcast %cst_67 : f32 to vector<8x128xf32>
    %143 = arith.mulf %142, %141 : vector<8x128xf32>
    %cst_68 = arith.constant 5.000000e-01 : f32
    %144 = vector.broadcast %cst_68 : f32 to vector<8x128xf32>
    %145 = arith.addf %143, %144 : vector<8x128xf32>
    %146 = vector.extract_strided_slice %129 {offsets = [0, 256], sizes = [8, 128], strides = [1, 1]} : vector<8x512xf32> to vector<8x128xf32>
    %147 = math.tanh %146 : vector<8x128xf32>
    %148 = vector.extract_strided_slice %129 {offsets = [0, 384], sizes = [8, 128], strides = [1, 1]} : vector<8x512xf32> to vector<8x128xf32>
    %cst_69 = arith.constant 5.000000e-01 : f32
    %149 = vector.broadcast %cst_69 : f32 to vector<8x128xf32>
    %150 = arith.mulf %149, %148 : vector<8x128xf32>
    %151 = math.tanh %150 : vector<8x128xf32>
    %cst_70 = arith.constant 5.000000e-01 : f32
    %152 = vector.broadcast %cst_70 : f32 to vector<8x128xf32>
    %153 = arith.mulf %152, %151 : vector<8x128xf32>
    %cst_71 = arith.constant 5.000000e-01 : f32
    %154 = vector.broadcast %cst_71 : f32 to vector<8x128xf32>
    %155 = arith.addf %153, %154 : vector<8x128xf32>
    %156 = arith.mulf %145, %120 : vector<8x128xf32>
    %157 = arith.mulf %137, %147 : vector<8x128xf32>
    %158 = arith.addf %156, %157 : vector<8x128xf32>
    %159 = math.tanh %158 : vector<8x128xf32>
    %160 = arith.mulf %155, %159 : vector<8x128xf32>
    %c3 = arith.constant 3 : index
    %c0_72 = arith.constant 0 : index
    %c0_73 = arith.constant 0 : index
    %161 = vector.load %arg6[%c3, %c0_72, %c0_73] : memref<8x8x128xf32, #tpu.memory_space<vmem>>, vector<1x8x128xf32>
    %162 = vector.shape_cast %161 : vector<1x8x128xf32> to vector<8x128xf32>
    %163 = vector.shape_cast %160 : vector<8x128xf32> to vector<1x8x128xf32>
    tpu.vector_store %arg6[%c3, %c0_72, %c0_73], %163 {strides = array<i32>} : memref<8x8x128xf32, #tpu.memory_space<vmem>>, vector<1x8x128xf32>,
    %c32 = arith.constant 32 : index
    %c0_74 = arith.constant 0 : index
    %164 = vector.load %arg12[%c32, %c0_74] : memref<64x512xf32, #tpu.memory_space<vmem>>, vector<8x512xf32>
    %c0_75 = arith.constant 0 : index
    %c0_76 = arith.constant 0 : index
    %165 = vector.load %arg8[%c0_75, %c0_76] : memref<128x512xf32, #tpu.memory_space<vmem>>, vector<128x512xf32>
    %cst_77 = arith.constant dense<0.000000e+00> : vector<8x512xf32>
    %166 = tpu.matmul %160, %165, %cst_77 {dimension_numbers = #tpu.dot_dimension_numbers<[1], [0], [0], [1], [0, 0, 1, 1], [], []>} : vector<8x128xf32>, vector<128x512xf32>, vector<8x512xf32> -> vector<8x512xf32>
    %167 = arith.addf %164, %166 : vector<8x512xf32>
    %168 = vector.extract_strided_slice %167 {offsets = [0, 0], sizes = [8, 128], strides = [1, 1]} : vector<8x512xf32> to vector<8x128xf32>
    %cst_78 = arith.constant 5.000000e-01 : f32
    %169 = vector.broadcast %cst_78 : f32 to vector<8x128xf32>
    %170 = arith.mulf %169, %168 : vector<8x128xf32>
    %171 = math.tanh %170 : vector<8x128xf32>
    %cst_79 = arith.constant 5.000000e-01 : f32
    %172 = vector.broadcast %cst_79 : f32 to vector<8x128xf32>
    %173 = arith.mulf %172, %171 : vector<8x128xf32>
    %cst_80 = arith.constant 5.000000e-01 : f32
    %174 = vector.broadcast %cst_80 : f32 to vector<8x128xf32>
    %175 = arith.addf %173, %174 : vector<8x128xf32>
    %176 = vector.extract_strided_slice %167 {offsets = [0, 128], sizes = [8, 128], strides = [1, 1]} : vector<8x512xf32> to vector<8x128xf32>
    %cst_81 = arith.constant 5.000000e-01 : f32
    %177 = vector.broadcast %cst_81 : f32 to vector<8x128xf32>
    %178 = arith.mulf %177, %176 : vector<8x128xf32>
    %179 = math.tanh %178 : vector<8x128xf32>
    %cst_82 = arith.constant 5.000000e-01 : f32
    %180 = vector.broadcast %cst_82 : f32 to vector<8x128xf32>
    %181 = arith.mulf %180, %179 : vector<8x128xf32>
    %cst_83 = arith.constant 5.000000e-01 : f32
    %182 = vector.broadcast %cst_83 : f32 to vector<8x128xf32>
    %183 = arith.addf %181, %182 : vector<8x128xf32>
    %184 = vector.extract_strided_slice %167 {offsets = [0, 256], sizes = [8, 128], strides = [1, 1]} : vector<8x512xf32> to vector<8x128xf32>
    %185 = math.tanh %184 : vector<8x128xf32>
    %186 = vector.extract_strided_slice %167 {offsets = [0, 384], sizes = [8, 128], strides = [1, 1]} : vector<8x512xf32> to vector<8x128xf32>
    %cst_84 = arith.constant 5.000000e-01 : f32
    %187 = vector.broadcast %cst_84 : f32 to vector<8x128xf32>
    %188 = arith.mulf %187, %186 : vector<8x128xf32>
    %189 = math.tanh %188 : vector<8x128xf32>
    %cst_85 = arith.constant 5.000000e-01 : f32
    %190 = vector.broadcast %cst_85 : f32 to vector<8x128xf32>
    %191 = arith.mulf %190, %189 : vector<8x128xf32>
    %cst_86 = arith.constant 5.000000e-01 : f32
    %192 = vector.broadcast %cst_86 : f32 to vector<8x128xf32>
    %193 = arith.addf %191, %192 : vector<8x128xf32>
    %194 = arith.mulf %183, %158 : vector<8x128xf32>
    %195 = arith.mulf %175, %185 : vector<8x128xf32>
    %196 = arith.addf %194, %195 : vector<8x128xf32>
    %197 = math.tanh %196 : vector<8x128xf32>
    %198 = arith.mulf %193, %197 : vector<8x128xf32>
    %c4 = arith.constant 4 : index
    %c0_87 = arith.constant 0 : index
    %c0_88 = arith.constant 0 : index
    %199 = vector.load %arg6[%c4, %c0_87, %c0_88] : memref<8x8x128xf32, #tpu.memory_space<vmem>>, vector<1x8x128xf32>
    %200 = vector.shape_cast %199 : vector<1x8x128xf32> to vector<8x128xf32>
    %201 = vector.shape_cast %198 : vector<8x128xf32> to vector<1x8x128xf32>
    tpu.vector_store %arg6[%c4, %c0_87, %c0_88], %201 {strides = array<i32>} : memref<8x8x128xf32, #tpu.memory_space<vmem>>, vector<1x8x128xf32>,
    %c40 = arith.constant 40 : index
    %c0_89 = arith.constant 0 : index
    %202 = vector.load %arg12[%c40, %c0_89] : memref<64x512xf32, #tpu.memory_space<vmem>>, vector<8x512xf32>
    %c0_90 = arith.constant 0 : index
    %c0_91 = arith.constant 0 : index
    %203 = vector.load %arg8[%c0_90, %c0_91] : memref<128x512xf32, #tpu.memory_space<vmem>>, vector<128x512xf32>
    %cst_92 = arith.constant dense<0.000000e+00> : vector<8x512xf32>
    %204 = tpu.matmul %198, %203, %cst_92 {dimension_numbers = #tpu.dot_dimension_numbers<[1], [0], [0], [1], [0, 0, 1, 1], [], []>} : vector<8x128xf32>, vector<128x512xf32>, vector<8x512xf32> -> vector<8x512xf32>
    %205 = arith.addf %202, %204 : vector<8x512xf32>
    %206 = vector.extract_strided_slice %205 {offsets = [0, 0], sizes = [8, 128], strides = [1, 1]} : vector<8x512xf32> to vector<8x128xf32>
    %cst_93 = arith.constant 5.000000e-01 : f32
    %207 = vector.broadcast %cst_93 : f32 to vector<8x128xf32>
    %208 = arith.mulf %207, %206 : vector<8x128xf32>
    %209 = math.tanh %208 : vector<8x128xf32>
    %cst_94 = arith.constant 5.000000e-01 : f32
    %210 = vector.broadcast %cst_94 : f32 to vector<8x128xf32>
    %211 = arith.mulf %210, %209 : vector<8x128xf32>
    %cst_95 = arith.constant 5.000000e-01 : f32
    %212 = vector.broadcast %cst_95 : f32 to vector<8x128xf32>
    %213 = arith.addf %211, %212 : vector<8x128xf32>
    %214 = vector.extract_strided_slice %205 {offsets = [0, 128], sizes = [8, 128], strides = [1, 1]} : vector<8x512xf32> to vector<8x128xf32>
    %cst_96 = arith.constant 5.000000e-01 : f32
    %215 = vector.broadcast %cst_96 : f32 to vector<8x128xf32>
    %216 = arith.mulf %215, %214 : vector<8x128xf32>
    %217 = math.tanh %216 : vector<8x128xf32>
    %cst_97 = arith.constant 5.000000e-01 : f32
    %218 = vector.broadcast %cst_97 : f32 to vector<8x128xf32>
    %219 = arith.mulf %218, %217 : vector<8x128xf32>
    %cst_98 = arith.constant 5.000000e-01 : f32
    %220 = vector.broadcast %cst_98 : f32 to vector<8x128xf32>
    %221 = arith.addf %219, %220 : vector<8x128xf32>
    %222 = vector.extract_strided_slice %205 {offsets = [0, 256], sizes = [8, 128], strides = [1, 1]} : vector<8x512xf32> to vector<8x128xf32>
    %223 = math.tanh %222 : vector<8x128xf32>
    %224 = vector.extract_strided_slice %205 {offsets = [0, 384], sizes = [8, 128], strides = [1, 1]} : vector<8x512xf32> to vector<8x128xf32>
    %cst_99 = arith.constant 5.000000e-01 : f32
    %225 = vector.broadcast %cst_99 : f32 to vector<8x128xf32>
    %226 = arith.mulf %225, %224 : vector<8x128xf32>
    %227 = math.tanh %226 : vector<8x128xf32>
    %cst_100 = arith.constant 5.000000e-01 : f32
    %228 = vector.broadcast %cst_100 : f32 to vector<8x128xf32>
    %229 = arith.mulf %228, %227 : vector<8x128xf32>
    %cst_101 = arith.constant 5.000000e-01 : f32
    %230 = vector.broadcast %cst_101 : f32 to vector<8x128xf32>
    %231 = arith.addf %229, %230 : vector<8x128xf32>
    %232 = arith.mulf %221, %196 : vector<8x128xf32>
    %233 = arith.mulf %213, %223 : vector<8x128xf32>
    %234 = arith.addf %232, %233 : vector<8x128xf32>
    %235 = math.tanh %234 : vector<8x128xf32>
    %236 = arith.mulf %231, %235 : vector<8x128xf32>
    %c5 = arith.constant 5 : index
    %c0_102 = arith.constant 0 : index
    %c0_103 = arith.constant 0 : index
    %237 = vector.load %arg6[%c5, %c0_102, %c0_103] : memref<8x8x128xf32, #tpu.memory_space<vmem>>, vector<1x8x128xf32>
    %238 = vector.shape_cast %237 : vector<1x8x128xf32> to vector<8x128xf32>
    %239 = vector.shape_cast %236 : vector<8x128xf32> to vector<1x8x128xf32>
    tpu.vector_store %arg6[%c5, %c0_102, %c0_103], %239 {strides = array<i32>} : memref<8x8x128xf32, #tpu.memory_space<vmem>>, vector<1x8x128xf32>,
    %c48 = arith.constant 48 : index
    %c0_104 = arith.constant 0 : index
    %240 = vector.load %arg12[%c48, %c0_104] : memref<64x512xf32, #tpu.memory_space<vmem>>, vector<8x512xf32>
    %c0_105 = arith.constant 0 : index
    %c0_106 = arith.constant 0 : index
    %241 = vector.load %arg8[%c0_105, %c0_106] : memref<128x512xf32, #tpu.memory_space<vmem>>, vector<128x512xf32>
    %cst_107 = arith.constant dense<0.000000e+00> : vector<8x512xf32>
    %242 = tpu.matmul %236, %241, %cst_107 {dimension_numbers = #tpu.dot_dimension_numbers<[1], [0], [0], [1], [0, 0, 1, 1], [], []>} : vector<8x128xf32>, vector<128x512xf32>, vector<8x512xf32> -> vector<8x512xf32>
    %243 = arith.addf %240, %242 : vector<8x512xf32>
    %244 = vector.extract_strided_slice %243 {offsets = [0, 0], sizes = [8, 128], strides = [1, 1]} : vector<8x512xf32> to vector<8x128xf32>
    %cst_108 = arith.constant 5.000000e-01 : f32
    %245 = vector.broadcast %cst_108 : f32 to vector<8x128xf32>
    %246 = arith.mulf %245, %244 : vector<8x128xf32>
    %247 = math.tanh %246 : vector<8x128xf32>
    %cst_109 = arith.constant 5.000000e-01 : f32
    %248 = vector.broadcast %cst_109 : f32 to vector<8x128xf32>
    %249 = arith.mulf %248, %247 : vector<8x128xf32>
    %cst_110 = arith.constant 5.000000e-01 : f32
    %250 = vector.broadcast %cst_110 : f32 to vector<8x128xf32>
    %251 = arith.addf %249, %250 : vector<8x128xf32>
    %252 = vector.extract_strided_slice %243 {offsets = [0, 128], sizes = [8, 128], strides = [1, 1]} : vector<8x512xf32> to vector<8x128xf32>
    %cst_111 = arith.constant 5.000000e-01 : f32
    %253 = vector.broadcast %cst_111 : f32 to vector<8x128xf32>
    %254 = arith.mulf %253, %252 : vector<8x128xf32>
    %255 = math.tanh %254 : vector<8x128xf32>
    %cst_112 = arith.constant 5.000000e-01 : f32
    %256 = vector.broadcast %cst_112 : f32 to vector<8x128xf32>
    %257 = arith.mulf %256, %255 : vector<8x128xf32>
    %cst_113 = arith.constant 5.000000e-01 : f32
    %258 = vector.broadcast %cst_113 : f32 to vector<8x128xf32>
    %259 = arith.addf %257, %258 : vector<8x128xf32>
    %260 = vector.extract_strided_slice %243 {offsets = [0, 256], sizes = [8, 128], strides = [1, 1]} : vector<8x512xf32> to vector<8x128xf32>
    %261 = math.tanh %260 : vector<8x128xf32>
    %262 = vector.extract_strided_slice %243 {offsets = [0, 384], sizes = [8, 128], strides = [1, 1]} : vector<8x512xf32> to vector<8x128xf32>
    %cst_114 = arith.constant 5.000000e-01 : f32
    %263 = vector.broadcast %cst_114 : f32 to vector<8x128xf32>
    %264 = arith.mulf %263, %262 : vector<8x128xf32>
    %265 = math.tanh %264 : vector<8x128xf32>
    %cst_115 = arith.constant 5.000000e-01 : f32
    %266 = vector.broadcast %cst_115 : f32 to vector<8x128xf32>
    %267 = arith.mulf %266, %265 : vector<8x128xf32>
    %cst_116 = arith.constant 5.000000e-01 : f32
    %268 = vector.broadcast %cst_116 : f32 to vector<8x128xf32>
    %269 = arith.addf %267, %268 : vector<8x128xf32>
    %270 = arith.mulf %259, %234 : vector<8x128xf32>
    %271 = arith.mulf %251, %261 : vector<8x128xf32>
    %272 = arith.addf %270, %271 : vector<8x128xf32>
    %273 = math.tanh %272 : vector<8x128xf32>
    %274 = arith.mulf %269, %273 : vector<8x128xf32>
    %c6 = arith.constant 6 : index
    %c0_117 = arith.constant 0 : index
    %c0_118 = arith.constant 0 : index
    %275 = vector.load %arg6[%c6, %c0_117, %c0_118] : memref<8x8x128xf32, #tpu.memory_space<vmem>>, vector<1x8x128xf32>
    %276 = vector.shape_cast %275 : vector<1x8x128xf32> to vector<8x128xf32>
    %277 = vector.shape_cast %274 : vector<8x128xf32> to vector<1x8x128xf32>
    tpu.vector_store %arg6[%c6, %c0_117, %c0_118], %277 {strides = array<i32>} : memref<8x8x128xf32, #tpu.memory_space<vmem>>, vector<1x8x128xf32>,
    %c56 = arith.constant 56 : index
    %c0_119 = arith.constant 0 : index
    %278 = vector.load %arg12[%c56, %c0_119] : memref<64x512xf32, #tpu.memory_space<vmem>>, vector<8x512xf32>
    %c0_120 = arith.constant 0 : index
    %c0_121 = arith.constant 0 : index
    %279 = vector.load %arg8[%c0_120, %c0_121] : memref<128x512xf32, #tpu.memory_space<vmem>>, vector<128x512xf32>
    %cst_122 = arith.constant dense<0.000000e+00> : vector<8x512xf32>
    %280 = tpu.matmul %274, %279, %cst_122 {dimension_numbers = #tpu.dot_dimension_numbers<[1], [0], [0], [1], [0, 0, 1, 1], [], []>} : vector<8x128xf32>, vector<128x512xf32>, vector<8x512xf32> -> vector<8x512xf32>
    %281 = arith.addf %278, %280 : vector<8x512xf32>
    %282 = vector.extract_strided_slice %281 {offsets = [0, 0], sizes = [8, 128], strides = [1, 1]} : vector<8x512xf32> to vector<8x128xf32>
    %cst_123 = arith.constant 5.000000e-01 : f32
    %283 = vector.broadcast %cst_123 : f32 to vector<8x128xf32>
    %284 = arith.mulf %283, %282 : vector<8x128xf32>
    %285 = math.tanh %284 : vector<8x128xf32>
    %cst_124 = arith.constant 5.000000e-01 : f32
    %286 = vector.broadcast %cst_124 : f32 to vector<8x128xf32>
    %287 = arith.mulf %286, %285 : vector<8x128xf32>
    %cst_125 = arith.constant 5.000000e-01 : f32
    %288 = vector.broadcast %cst_125 : f32 to vector<8x128xf32>
    %289 = arith.addf %287, %288 : vector<8x128xf32>
    %290 = vector.extract_strided_slice %281 {offsets = [0, 128], sizes = [8, 128], strides = [1, 1]} : vector<8x512xf32> to vector<8x128xf32>
    %cst_126 = arith.constant 5.000000e-01 : f32
    %291 = vector.broadcast %cst_126 : f32 to vector<8x128xf32>
    %292 = arith.mulf %291, %290 : vector<8x128xf32>
    %293 = math.tanh %292 : vector<8x128xf32>
    %cst_127 = arith.constant 5.000000e-01 : f32
    %294 = vector.broadcast %cst_127 : f32 to vector<8x128xf32>
    %295 = arith.mulf %294, %293 : vector<8x128xf32>
    %cst_128 = arith.constant 5.000000e-01 : f32
    %296 = vector.broadcast %cst_128 : f32 to vector<8x128xf32>
    %297 = arith.addf %295, %296 : vector<8x128xf32>
    %298 = vector.extract_strided_slice %281 {offsets = [0, 256], sizes = [8, 128], strides = [1, 1]} : vector<8x512xf32> to vector<8x128xf32>
    %299 = math.tanh %298 : vector<8x128xf32>
    %300 = vector.extract_strided_slice %281 {offsets = [0, 384], sizes = [8, 128], strides = [1, 1]} : vector<8x512xf32> to vector<8x128xf32>
    %cst_129 = arith.constant 5.000000e-01 : f32
    %301 = vector.broadcast %cst_129 : f32 to vector<8x128xf32>
    %302 = arith.mulf %301, %300 : vector<8x128xf32>
    %303 = math.tanh %302 : vector<8x128xf32>
    %cst_130 = arith.constant 5.000000e-01 : f32
    %304 = vector.broadcast %cst_130 : f32 to vector<8x128xf32>
    %305 = arith.mulf %304, %303 : vector<8x128xf32>
    %cst_131 = arith.constant 5.000000e-01 : f32
    %306 = vector.broadcast %cst_131 : f32 to vector<8x128xf32>
    %307 = arith.addf %305, %306 : vector<8x128xf32>
    %308 = arith.mulf %297, %272 : vector<8x128xf32>
    %309 = arith.mulf %289, %299 : vector<8x128xf32>
    %310 = arith.addf %308, %309 : vector<8x128xf32>
    %311 = math.tanh %310 : vector<8x128xf32>
    %312 = arith.mulf %307, %311 : vector<8x128xf32>
    %c7 = arith.constant 7 : index
    %c0_132 = arith.constant 0 : index
    %c0_133 = arith.constant 0 : index
    %313 = vector.load %arg6[%c7, %c0_132, %c0_133] : memref<8x8x128xf32, #tpu.memory_space<vmem>>, vector<1x8x128xf32>
    %314 = vector.shape_cast %313 : vector<1x8x128xf32> to vector<8x128xf32>
    %315 = vector.shape_cast %312 : vector<8x128xf32> to vector<1x8x128xf32>
    tpu.vector_store %arg6[%c7, %c0_132, %c0_133], %315 {strides = array<i32>} : memref<8x8x128xf32, #tpu.memory_space<vmem>>, vector<1x8x128xf32>,
    %c0_134 = arith.constant 0 : index
    %c0_135 = arith.constant 0 : index
    %316 = vector.load %arg10[%c0_134, %c0_135] : memref<8x128xf32, #tpu.memory_space<vmem>>, vector<8x128xf32>
    tpu.vector_store %arg10[%c0_134, %c0_135], %312 {strides = array<i32>} : memref<8x128xf32, #tpu.memory_space<vmem>>, vector<8x128xf32>,
    %c0_136 = arith.constant 0 : index
    %c0_137 = arith.constant 0 : index
    %317 = vector.load %arg11[%c0_136, %c0_137] : memref<8x128xf32, #tpu.memory_space<vmem>>, vector<8x128xf32>
    tpu.vector_store %arg11[%c0_136, %c0_137], %310 {strides = array<i32>} : memref<8x128xf32, #tpu.memory_space<vmem>>, vector<8x128xf32>,
    return
  }
  func.func @transform_0(%arg0: i32, %arg1: i32) -> (i32, i32) {
    %c0_i32 = arith.constant 0 : i32
    %c0_i32_0 = arith.constant 0 : i32
    return %arg1, %c0_i32 : i32, i32
  }
  func.func @transform_4(%arg0: i32, %arg1: i32) -> (i32, i32, i32) {
    %c0_i32 = arith.constant 0 : i32
    %c0_i32_0 = arith.constant 0 : i32
    %c0_i32_1 = arith.constant 0 : i32
    return %arg1, %c0_i32, %c0_i32_0 : i32, i32, i32
  }
}

</mosaic_0001>

<bundles_post_ra>
// kernel: tpu_custom_call.1
= control target key start
LH: loop header
LB: loop body
LE: loop exit
PB: predicated region body
PF: predicated region fallthrough
CT: control target
= control target key end

     0   :  { %9 = vsyncpa [#allocation10], 0  ;;  %s3731_s0 = inlined_call_operand.vmem [shape: f32[64,16], index: 0, kind: input, shape index: {}]   ;;  %s3732_s1 = inlined_call_operand.vmem [shape: f32[1,16,512], index: 1, kind: input, shape index: {}]   ;;  %s3733_s2 = inlined_call_operand.hbm [shape: f32[1,128,512], index: 2, kind: input, shape index: {}]   ;;  %s3734_s3 = inlined_call_operand.vmem [shape: f32[1,1,512], index: 3, kind: input, shape index: {}]   ;;  %s3735_s4 = inlined_call_operand.hbm [shape: f32[8,8,128], index: 4, kind: output, shape index: {}]  }
   0x1   :  { %v51_v0 = vld [vmem:[%s3732_s1] sm:$0xff]  ;;  %v53_v1 = vld [vmem:[%s3732_s1 + $0x8] sm:$0xff]  ;;  %v55_v2 = vld [vmem:[%s3732_s1 + $0x10] sm:$0xff] }
   0x2   :  { %v57_v3 = vld [vmem:[%s3732_s1 + $0x18] sm:$0xff]  ;;  %v59_v4 = vld [vmem:[%s3732_s1 + $0x20] sm:$0xff]  ;;  %v61_v5 = vld [vmem:[%s3732_s1 + $0x28] sm:$0xff] }
   0x3   :  { %v63_v6 = vld [vmem:[%s3732_s1 + $0x30] sm:$0xff]  ;;  %v65_v7 = vld [vmem:[%s3732_s1 + $0x38] sm:$0xff] }
   0x4   :  { %74 = vsyncadd [#allocation8], 1024  ;;  %v110_v8 = vld [vmem:[%s3734_s3] sm:$0xf]  ;;  %s3140_s7 = smov [#allocation3]   ;;  %s3088_s11 = scalar_lea.hbm %s3733_s2, 8192 }
   0x5   :  { %s86_s8 = sshll.u32 %s3140_s7, 4  ;;  %111 = vst [vmem:[#allocation4] sm:$0xf] %v110_v8  ;;  %p3089_p0 = scmp.ne.s32.totalorder %s3733_s2, %s3088_s11  ;;  %s87_s8 = int_to_ptr.vmem [resolvable:$true] %s86_s8 }
   0x6   :  { %p3092_p1 = scmp.lt.u32.totalorder %s3088_s11, %s3733_s2 }
   0x8   :  { %p3094_p2 = pnand %p3092_p1, %p3089_p0 }
   0xa   :  { %3097 = shalt.err (!%p3094_p2)  }
   0xb   :  { %s3098_s1 = scalar_lea.vmem %s87_s8, 8192  ;;  %p3103_p4 = scmp.lt.s32.totalorder %s87_s8, %s87_s8 }
   0xc   :  { %p3099_p3 = scmp.ne.s32.totalorder %s87_s8, %s3098_s1  ;;  %p3104_p5 = scmp.lt.s32.totalorder %s3098_s1, %s3098_s1 }
   0xe   :  { %p3105_p6 = por %p3104_p5, %p3103_p4 }
  0x10   :  { %p3106_p7 = pnand %p3105_p6, %p3099_p3 }
  0x12   :  { %3109 = shalt.err (!%p3106_p7)  }
  0x13   :  { %89 = dma.hbm_to_vmem [thread:$0]  %s3733_s2, 8192, %s87_s8, [#allocation8 + $0x1] }
  0x14   :  { %136 = vsyncadd [#allocation8 + $0x2], 64 }
  0x15   :  { %3132 = dma.done.wait [#allocation8], 1024 }
  0x16   :  { %3133 = vsyncadd [#allocation8], 4294966272 }
  0x17   :  { %3134 = dma.done.wait [#allocation8 + $0x1], 8192 }
  0x18   :  { %3135 = vsyncadd [#allocation8 + $0x1], 4294959104 }
  0x19   :  { %3136 = dma.done.wait [#allocation8 + $0x2], 64 }
  0x1a   :  { %3137 = vsyncadd [#allocation8 + $0x2], 4294967232  ;;  %v2419_v9 = vpack.c.bf16 %v61_v5, %v53_v1  ;;  %v2423_v10 = vpack.c.bf16 %v65_v7, %v57_v3  ;;  %v2421_v11 = vpack.c.bf16 %v59_v4, %v51_v0  ;;  %v2425_v12 = vpack.c.bf16 %v63_v6, %v55_v2  ;;  %v150_v14 = vld [vmem:[%s3731_s0] sm:$0xff]  ;;  %v478_v15 = vld [vmem:[#allocation3 + $0x8] sm:$0xff] }
  0x1b   :  { %v3141_v13 = vmov 0.0   ;;  %vm188_vm0 = vcmask 130048   ;;  %v482_v16 = vld [vmem:[#allocation3 + $0x28] sm:$0xff]  ;;  %v480_v18 = vld [vmem:[#allocation3 + $0x18] sm:$0xff]  ;;  %v477_v20 = vld [vmem:[#allocation3] sm:$0xff] }
  0x1c   :  { %2420 = vmatprep.subr.bf16.mxu0 %v2419_v9  ;;  %2424 = vmatprep.subr.bf16.mxu1 %v2423_v10  ;;  %v3216_v17 = vpack.c.bf16 %v482_v16, %v478_v15  ;;  %v484_v19 = vld [vmem:[#allocation3 + $0x38] sm:$0xff]  ;;  %v481_v22 = vld [vmem:[#allocation3 + $0x20] sm:$0xff]  ;;  %v479_v23 = vld [vmem:[#allocation3 + $0x10] sm:$0xff] }
  0x1d   :  { %2422 = vmatpush1.bf16.msra.mxu0 %v2421_v11  ;;  %2426 = vmatpush1.bf16.msra.mxu1 %v2425_v12  ;;  %v3218_v21 = vpack.c.bf16 %v484_v19, %v480_v18  ;;  %v483_v24 = vld [vmem:[#allocation3 + $0x30] sm:$0xff]  ;;  %v3223_v25 = vpack.c.bf16 %v481_v22, %v477_v20  ;;  %v151_v27 = vld [vmem:[%s3731_s0 + $0x8] sm:$0xff]  ;;  %v488_v31 = vld [vmem:[#allocation3 + $0x58] sm:$0xff] }
  0x1e   :  { %277 = vmatprep.mubr.f32.mxu0 %v3141_v13  ;;  %390 = vmatprep.mubr.f32.mxu1 %v3141_v13  ;;  %v3225_v26 = vpack.c.bf16 %v483_v24, %v479_v23  ;;  %v486_v28 = vld [vmem:[#allocation3 + $0x48] sm:$0xff]  ;;  %v492_v32 = vld [vmem:[#allocation3 + $0x78] sm:$0xff]  ;;  %v485_v33 = vld [vmem:[#allocation3 + $0x40] sm:$0xff] }
  0x1f   :  { %2428 = vmatprep.subr.bf16.mxu0 %v3216_v17  ;;  %v490_v29 = vld [vmem:[#allocation3 + $0x68] sm:$0xff]  ;;  %2460 = vmatprep.subr.bf16.mxu1 %v3218_v21  ;;  %v3235_v34 = vpack.c.bf16 %v492_v32, %v488_v31  ;;  %v489_v35 = vld [vmem:[#allocation3 + $0x60] sm:$0xff]  ;;  %v487_v36 = vld [vmem:[#allocation3 + $0x50] sm:$0xff] }
  0x20   :  { %2400 = vmatmul.mubr.msk.f32.vlgmr.msra.gmra.mrb[0].mxu0 %vm188_vm0, %v150_v14  ;;  %2408 = vmatmul.mubr.msk.f32.vlgmr.msra.gmra.mrb[0].mxu1 %vm188_vm0, %v150_v14  ;;  %v3231_v30 = vpack.c.bf16 %v490_v29, %v486_v28  ;;  %v491_v37 = vld [vmem:[#allocation3 + $0x70] sm:$0xff]  ;;  %v3239_v38 = vpack.c.bf16 %v489_v35, %v485_v33  ;;  %v494_v41 = vld [vmem:[#allocation3 + $0x88] sm:$0xff]  ;;  %v496_v44 = vld [vmem:[#allocation3 + $0x98] sm:$0xff] }
  0x21   :  { %283 = vmatprep.mubr.f32.mxu0 %v3141_v13  ;;  %396 = vmatprep.mubr.f32.mxu1 %v3141_v13  ;;  %v3241_v39 = vpack.c.bf16 %v491_v37, %v487_v36  ;;  %v152_v40 = vld [vmem:[%s3731_s0 + $0x10] sm:$0xff]  ;;  %v498_v42 = vld [vmem:[#allocation3 + $0xa8] sm:$0xff]  ;;  %v500_v45 = vld [vmem:[#allocation3 + $0xb8] sm:$0xff] }
  0x22   :  { %2430 = vmatpush1.bf16.msra.mxu0 %v3223_v25  ;;  %2462 = vmatpush1.bf16.msra.mxu1 %v3225_v26  ;;  %v3248_v43 = vpack.c.bf16 %v498_v42, %v494_v41  ;;  %v493_v46 = vld [vmem:[#allocation3 + $0x80] sm:$0xff]  ;;  %v3252_v47 = vpack.c.bf16 %v500_v45, %v496_v44  ;;  %v495_v49 = vld [vmem:[#allocation3 + $0x90] sm:$0xff]  ;;  %v153_v53 = vld [vmem:[%s3731_s0 + $0x18] sm:$0xff] }
  0x23   :  { %2432 = vmatprep.subr.bf16.mxu0 %v3231_v30  ;;  %2464 = vmatprep.subr.bf16.mxu1 %v3235_v34  ;;  %v497_v48 = vld [vmem:[#allocation3 + $0xa0] sm:$0xff]  ;;  %v499_v50 = vld [vmem:[#allocation3 + $0xb0] sm:$0xff]  ;;  %v502_v54 = vld [vmem:[#allocation3 + $0xc8] sm:$0xff] }
  0x24   :  { %2401 = vmatmul.mubr.msk.f32.gmra.mrb[2].mxu0 %vm188_vm0, %v151_v27  ;;  %2409 = vmatmul.mubr.msk.f32.gmra.mrb[2].mxu1 %vm188_vm0, %v151_v27  ;;  %v3256_v51 = vpack.c.bf16 %v497_v48, %v493_v46  ;;  %v3258_v52 = vpack.c.bf16 %v499_v50, %v495_v49  ;;  %v506_v55 = vld [vmem:[#allocation3 + $0xe8] sm:$0xff]  ;;  %v504_v56 = vld [vmem:[#allocation3 + $0xd8] sm:$0xff]  ;;  %v501_v58 = vld [vmem:[#allocation3 + $0xc0] sm:$0xff] }
  0x25   :  { %289 = vmatprep.mubr.f32.mxu0 %v3141_v13  ;;  %402 = vmatprep.mubr.f32.mxu1 %v3141_v13  ;;  %v508_v57 = vld [vmem:[#allocation3 + $0xf8] sm:$0xff]  ;;  %v3267_v59 = vpack.c.bf16 %v506_v55, %v502_v54  ;;  %v505_v61 = vld [vmem:[#allocation3 + $0xe0] sm:$0xff]  ;;  %v503_v62 = vld [vmem:[#allocation3 + $0xd0] sm:$0xff] }
  0x26   :  { %2434 = vmatpush1.bf16.msra.mxu0 %v3239_v38  ;;  %2466 = vmatpush1.bf16.msra.mxu1 %v3241_v39  ;;  %v3269_v60 = vpack.c.bf16 %v508_v57, %v504_v56  ;;  %v507_v63 = vld [vmem:[#allocation3 + $0xf0] sm:$0xff]  ;;  %v510_v0 = vld [vmem:[#allocation3 + $0x108] sm:$0xff]  ;;  %v3275_v2 = vpack.c.bf16 %v505_v61, %v501_v58  ;;  %v512_v4 = vld [vmem:[#allocation3 + $0x118] sm:$0xff] }
  0x27   :  { %2436 = vmatprep.subr.bf16.mxu0 %v3248_v43  ;;  %2468 = vmatprep.subr.bf16.mxu1 %v3252_v47  ;;  %v514_v1 = vld [vmem:[#allocation3 + $0x128] sm:$0xff]  ;;  %v3277_v3 = vpack.c.bf16 %v507_v63, %v503_v62  ;;  %v516_v5 = vld [vmem:[#allocation3 + $0x138] sm:$0xff]  ;;  %v509_v6 = vld [vmem:[#allocation3 + $0x100] sm:$0xff] }
  0x28   :  { %2402 = vmatmul.mubr.msk.f32.gmra.mrb[4].mxu0 %vm188_vm0, %v152_v40  ;;  %2410 = vmatmul.mubr.msk.f32.gmra.mrb[4].mxu1 %vm188_vm0, %v152_v40  ;;  %v513_v7 = vld [vmem:[#allocation3 + $0x120] sm:$0xff]  ;;  %v511_v8 = vld [vmem:[#allocation3 + $0x110] sm:$0xff]  ;;  %v3286_v11 = vpack.c.bf16 %v514_v1, %v510_v0  ;;  %v3288_v12 = vpack.c.bf16 %v516_v5, %v512_v4  ;;  %v518_v14 = vld [vmem:[#allocation3 + $0x148] sm:$0xff] }
  0x29   :  { %295 = vmatprep.mubr.f32.mxu0 %v3141_v13  ;;  %408 = vmatprep.mubr.f32.mxu1 %v3141_v13  ;;  %v515_v9 = vld [vmem:[#allocation3 + $0x130] sm:$0xff]  ;;  %v154_v10 = vld [vmem:[%s3731_s0 + $0x20] sm:$0xff]  ;;  %v522_v15 = vld [vmem:[#allocation3 + $0x168] sm:$0xff]  ;;  %v3294_v19 = vpack.c.bf16 %v513_v7, %v509_v6  ;;  %v168_v7 = vlaneseq }
  0x2a   :  { %2438 = vmatpush1.bf16.msra.mxu0 %v3256_v51  ;;  %2470 = vmatpush1.bf16.msra.mxu1 %v3258_v52  ;;  %v520_v16 = vld [vmem:[#allocation3 + $0x158] sm:$0xff]  ;;  %v3296_v20 = vpack.c.bf16 %v515_v9, %v511_v8  ;;  %v517_v22 = vld [vmem:[#allocation3 + $0x140] sm:$0xff]  ;;  %v519_v24 = vld [vmem:[#allocation3 + $0x150] sm:$0xff]  ;;  %v3305_v29 = vpack.c.bf16 %v522_v15, %v518_v14 }
  0x2b   :  { %2440 = vmatprep.subr.bf16.mxu0 %v3267_v59  ;;  %2472 = vmatprep.subr.bf16.mxu1 %v3269_v60  ;;  %v524_v18 = vld [vmem:[#allocation3 + $0x178] sm:$0xff]  ;;  %v521_v23 = vld [vmem:[#allocation3 + $0x160] sm:$0xff]  ;;  %v523_v27 = vld [vmem:[#allocation3 + $0x170] sm:$0xff]  ;;  %v169_v8 = vshrl.u32 %v168_v7, 7 }
  0x2c   :  { %2403 = vmatmul.mubr.msk.f32.gmra.mrb[6].mxu0 %vm188_vm0, %v153_v53  ;;  %2411 = vmatmul.mubr.msk.f32.gmra.mrb[6].mxu1 %vm188_vm0, %v153_v53  ;;  %v155_v28 = vld [vmem:[%s3731_s0 + $0x28] sm:$0xff]  ;;  %v3307_v31 = vpack.c.bf16 %v524_v18, %v520_v16  ;;  %v528_v35 = vld [vmem:[#allocation3 + $0x198] sm:$0xff]  ;;  %v3313_v37 = vpack.c.bf16 %v521_v23, %v517_v22  ;;  %v3315_v40 = vpack.c.bf16 %v523_v27, %v519_v24  ;;  %v525_v41 = vld [vmem:[#allocation3 + $0x180] sm:$0xff] }
  0x2d   :  { %301 = vmatprep.mubr.f32.mxu0 %v3141_v13  ;;  %414 = vmatprep.mubr.f32.mxu1 %v3141_v13  ;;  %v526_v32 = vld [vmem:[#allocation3 + $0x188] sm:$0xff]  ;;  %v532_v36 = vld [vmem:[#allocation3 + $0x1b8] sm:$0xff]  ;;  %v529_v42 = vld [vmem:[#allocation3 + $0x1a0] sm:$0xff]  ;;  %v170_v9 = vsub.s32 0, %v169_v8  ;;  %v174_v14 = vsub.s32 1, %v169_v8  ;;  %v178_v16 = vsub.s32 2, %v169_v8 }
  0x2e   :  { %2442 = vmatpush1.bf16.msra.mxu0 %v3275_v2  ;;  %2474 = vmatpush1.bf16.msra.mxu1 %v3277_v3  ;;  %v530_v33 = vld [vmem:[#allocation3 + $0x1a8] sm:$0xff]  ;;  %v527_v44 = vld [vmem:[#allocation3 + $0x190] sm:$0xff]  ;;  %v3326_v49 = vpack.c.bf16 %v532_v36, %v528_v35  ;;  %v536_v54 = vld [vmem:[#allocation3 + $0x1d8] sm:$0xff]  ;;  %v3332_v56 = vpack.c.bf16 %v529_v42, %v525_v41 }
  0x2f   :  { %2444 = vmatprep.subr.bf16.mxu0 %v3286_v11  ;;  %2476 = vmatprep.subr.bf16.mxu1 %v3288_v12  ;;  %v531_v45 = vld [vmem:[#allocation3 + $0x1b0] sm:$0xff]  ;;  %v3324_v48 = vpack.c.bf16 %v530_v33, %v526_v32  ;;  %v534_v50 = vld [vmem:[#allocation3 + $0x1c8] sm:$0xff]  ;;  %v540_v55 = vld [vmem:[#allocation3 + $0x1f8] sm:$0xff] }
  0x30   :  { %2404 = vmatmul.mubr.msk.f32.gmra.mrb[8].mxu0 %vm188_vm0, %v154_v10  ;;  %2412 = vmatmul.mubr.msk.f32.gmra.mrb[8].mxu1 %vm188_vm0, %v154_v10  ;;  %v156_v46 = vld [vmem:[%s3731_s0 + $0x30] sm:$0xff]  ;;  %v538_v53 = vld [vmem:[#allocation3 + $0x1e8] sm:$0xff]  ;;  %v3334_v57 = vpack.c.bf16 %v531_v45, %v527_v44  ;;  %v533_v58 = vld [vmem:[#allocation3 + $0x1c0] sm:$0xff]  ;;  %v3345_v4 = vpack.c.bf16 %v540_v55, %v536_v54 }
  0x31   :  { %307 = vmatprep.mubr.f32.mxu0 %v3141_v13  ;;  %420 = vmatprep.mubr.f32.mxu1 %v3141_v13  ;;  %v537_v61 = vld [vmem:[#allocation3 + $0x1e0] sm:$0xff]  ;;  %v535_v62 = vld [vmem:[#allocation3 + $0x1d0] sm:$0xff]  ;;  %v157_v0 = vld [vmem:[%s3731_s0 + $0x38] sm:$0xff]  ;;  %v3343_v1 = vpack.c.bf16 %v538_v53, %v534_v50  ;;  %s3142_s0 = smov [#allocation9]  }
  0x32   :  { %2446 = vmatpush1.bf16.msra.mxu0 %v3294_v19  ;;  %2478 = vmatpush1.bf16.msra.mxu1 %v3296_v20  ;;  %v539_v63 = vld [vmem:[#allocation3 + $0x1f0] sm:$0xff]  ;;  %v3351_v5 = vpack.c.bf16 %v537_v61, %v533_v58  ;;  %v166_v10 = vld [vmem:[#allocation4] sm:$0xf]  ;;  %s2351_s6 = sshll.u32 %s3142_s0, 4  ;;  %s2352_s6 = int_to_ptr.vmem [resolvable:$true] %s2351_s6 }
  0x33   :  { %2448 = vmatprep.subr.bf16.mxu0 %v3305_v29  ;;  %2480 = vmatprep.subr.bf16.mxu1 %v3307_v31  ;;  %v3353_v6 = vpack.c.bf16 %v539_v63, %v535_v62  ;;  %v3401_v15 = vrot.slane %v166_v10, %v170_v9  ;;  %v3403_v18 = vrot.slane %v166_v10, %v174_v14  ;;  %s3110_s7 = scalar_lea.vmem %s2352_s6, 1024  ;;  %p3115_p9 = scmp.lt.s32.totalorder %s2352_s6, %s2352_s6 }
  0x34   :  { %2405 = vmatmul.mubr.msk.f32.gmra.mrb[10].mxu0 %vm188_vm0, %v155_v28  ;;  %2413 = vmatmul.mubr.msk.f32.gmra.mrb[10].mxu1 %vm188_vm0, %v155_v28  ;;  %v3406_v27 = vrot.slane %v166_v10, %v178_v16  ;;  %p3111_p8 = scmp.ne.s32.totalorder %s2352_s6, %s3110_s7  ;;  %p3116_p10 = scmp.lt.s32.totalorder %s3110_s7, %s3110_s7 }
  0x35   :  { %313 = vmatprep.mubr.f32.mxu0 %v3141_v13  ;;  %426 = vmatprep.mubr.f32.mxu1 %v3141_v13 }
  0x36   :  { %2450 = vmatpush1.bf16.msra.mxu0 %v3313_v37  ;;  %2482 = vmatpush1.bf16.msra.mxu1 %v3315_v40  ;;  %p3117_p11 = por %p3116_p10, %p3115_p9 }
  0x37   :  { %2452 = vmatprep.subr.bf16.mxu0 %v3324_v48  ;;  %2484 = vmatprep.subr.bf16.mxu1 %v3326_v49 }
  0x38   :  { %2406 = vmatmul.mubr.msk.f32.gmra.mrb[12].mxu0 %vm188_vm0, %v156_v46  ;;  %2414 = vmatmul.mubr.msk.f32.gmra.mrb[12].mxu1 %vm188_vm0, %v156_v46  ;;  %p3118_p12 = pnand %p3117_p11, %p3111_p8 }
  0x39   :  { %319 = vmatprep.mubr.f32.mxu0 %v3141_v13  ;;  %432 = vmatprep.mubr.f32.mxu1 %v3141_v13 }
  0x3a   :  { %2454 = vmatpush1.bf16.msra.mxu0 %v3332_v56  ;;  %2486 = vmatpush1.bf16.msra.mxu1 %v3334_v57 }
  0x3b   :  { %2456 = vmatprep.subr.bf16.mxu0 %v3343_v1  ;;  %2488 = vmatprep.subr.bf16.mxu1 %v3345_v4 }
  0x3c   :  { %2407 = vmatmul.mubr.msk.f32.gmra.mrb[14].mxu0 %vm188_vm0, %v157_v0  ;;  %2415 = vmatmul.mubr.msk.f32.gmra.mrb[14].mxu1 %vm188_vm0, %v157_v0 }
  0x3d   :  { %605 = vmatprep.mubr.f32.mxu0 %v3141_v13  ;;  %676 = vmatprep.mubr.f32.mxu1 %v3141_v13 }
  0x3e   :  { %2458 = vmatpush1.bf16.msra.mxu0 %v3351_v5  ;;  %2490 = vmatpush1.bf16.msra.mxu1 %v3353_v6 }
  0x3f   :  { %2492 = vmatprep.subr.bf16.mxu0 %v3216_v17  ;;  %2524 = vmatprep.subr.bf16.mxu1 %v3218_v21 }
  0x41   :  { %606 = vmatmul.mubr.f32.vlgmr.msra.gmra.mrb[0].mxu0 %v3141_v13  ;;  %677 = vmatmul.mubr.f32.vlgmr.msra.gmra.mrb[0].mxu1 %v3141_v13 }
  0x42   :  { %2494 = vmatpush1.bf16.msra.mxu0 %v3223_v25  ;;  %2526 = vmatpush1.bf16.msra.mxu1 %v3225_v26 }
  0x43   :  { %2496 = vmatprep.subr.bf16.mxu0 %v3231_v30  ;;  %2528 = vmatprep.subr.bf16.mxu1 %v3235_v34 }
  0x44   :  { %838 = vmatprep.mubr.f32.mxu0 %v3141_v13  ;;  %909 = vmatprep.mubr.f32.mxu1 %v3141_v13 }
  0x46   :  { %2498 = vmatpush1.bf16.msra.mxu0 %v3239_v38  ;;  %2530 = vmatpush1.bf16.msra.mxu1 %v3241_v39 }
  0x47   :  { %2500 = vmatprep.subr.bf16.mxu0 %v3248_v43  ;;  %2532 = vmatprep.subr.bf16.mxu1 %v3252_v47 }
  0x4a   :  { %2502 = vmatpush1.bf16.msra.mxu0 %v3256_v51  ;;  %2534 = vmatpush1.bf16.msra.mxu1 %v3258_v52 }
  0x4b   :  { %2504 = vmatprep.subr.bf16.mxu0 %v3267_v59  ;;  %2536 = vmatprep.subr.bf16.mxu1 %v3269_v60 }
  0x4e   :  { %2506 = vmatpush1.bf16.msra.mxu0 %v3275_v2  ;;  %2538 = vmatpush1.bf16.msra.mxu1 %v3277_v3 }
  0x4f   :  { %2508 = vmatprep.subr.bf16.mxu0 %v3286_v11  ;;  %2540 = vmatprep.subr.bf16.mxu1 %v3288_v12 }
  0x52   :  { %2510 = vmatpush1.bf16.msra.mxu0 %v3294_v19  ;;  %2542 = vmatpush1.bf16.msra.mxu1 %v3296_v20 }
  0x53   :  { %2512 = vmatprep.subr.bf16.mxu0 %v3305_v29  ;;  %2544 = vmatprep.subr.bf16.mxu1 %v3307_v31 }
  0x56   :  { %2514 = vmatpush1.bf16.msra.mxu0 %v3313_v37  ;;  %2546 = vmatpush1.bf16.msra.mxu1 %v3315_v40 }
  0x57   :  { %2516 = vmatprep.subr.bf16.mxu0 %v3324_v48  ;;  %2548 = vmatprep.subr.bf16.mxu1 %v3326_v49 }
  0x5a   :  { %2518 = vmatpush1.bf16.msra.mxu0 %v3332_v56  ;;  %2550 = vmatpush1.bf16.msra.mxu1 %v3334_v57 }
  0x5b   :  { %2520 = vmatprep.subr.bf16.mxu0 %v3343_v1  ;;  %2552 = vmatprep.subr.bf16.mxu1 %v3345_v4 }
  0x5e   :  { %2522 = vmatpush1.bf16.msra.mxu0 %v3351_v5  ;;  %2554 = vmatpush1.bf16.msra.mxu1 %v3353_v6 }
  0x5f   :  { %2556 = vmatprep.subr.bf16.mxu0 %v3216_v17  ;;  %2588 = vmatprep.subr.bf16.mxu1 %v3218_v21  ;;  %v182_v17 = vsub.s32 3, %v169_v8 }
  0x61   :  { %v3410_v41 = vrot.slane %v166_v10, %v182_v17 }
 0x114   :  { %v607_v22 = vpop.f32.mrb[0].mxu0  ;;  %v678_v23 = vpop.f32.mrb[0].mxu1 }
 0x115   :  { %v2939_v24 = vadd.f32 %v607_v22, %v3401_v15  ;;  %v609_v28 = vpop.f32.mrb[1].mxu0  ;;  %v680_v32 = vpop.f32.mrb[1].mxu1  ;;  %v2955_v36 = vadd.f32 %v678_v23, %v3406_v27 }
 0x116   :  { %v2940_v21 = vadd.f32 %v609_v28, %v3403_v18  ;;  %v2956_v42 = vadd.f32 %v680_v32, %v3410_v41 }
 0x117   :  { %v687_v33 = vmul.f32 0.5, %v2939_v24 }
 0x118   :  { %v691_v35 = vmul.f32 0.5, %v2940_v21  ;;  %v696_v44 = vmul.f32 0.5, %v2956_v42 }
 0x119   :  { %3008 = vtanh.f32 %v687_v33 }
 0x11a   :  { %3010 = vtanh.f32 %v691_v35 }
 0x11b   :  { %3012 = vtanh.f32 %v2955_v36 }
 0x11c   :  { %3014 = vtanh.f32 %v696_v44 }
 0x123   :  { %v3009_v45 = vpop.eup %3008 }
 0x124   :  { %v3011_v46 = vpop.eup %3010  ;;  %v689_v50 = vmul.f32 0.5, %v3009_v45 }
 0x125   :  { %v693_v53 = vmul.f32 0.5, %v3011_v46  ;;  %v3013_v55 = vpop.eup %3012 }
 0x126   :  { %v690_v54 = vadd.f32 0.5, %v689_v50  ;;  %v3015_v0 = vpop.eup %3014  ;;  %v1179_v50 = vld [vmem:[#allocation3 + $0x8] sm:$0xff] }
 0x127   :  { %v694_v58 = vadd.f32 0.5, %v693_v53  ;;  %v698_v7 = vmul.f32 0.5, %v3015_v0  ;;  %v1183_v53 = vld [vmem:[#allocation3 + $0x28] sm:$0xff] }
 0x128   :  { %v701_v61 = vmul.f32 %v3013_v55, %v690_v54  ;;  %v1181_v54 = vld [vmem:[#allocation3 + $0x18] sm:$0xff]  ;;  %v3458_v55 = vpack.c.bf16 %v1183_v53, %v1179_v50 }
 0x129   :  { %v700_v62 = vmul.f32 0.0, %v694_v58  ;;  %v699_v8 = vadd.f32 0.5, %v698_v7  ;;  %v1185_v58 = vld [vmem:[#allocation3 + $0x38] sm:$0xff]  ;;  %v1180_v7 = vld [vmem:[#allocation3 + $0x10] sm:$0xff] }
 0x12b   :  { %v3413_v63 = vadd.f32 %v701_v61, %v700_v62  ;;  %v1178_v61 = vld [vmem:[#allocation3] sm:$0xff] }
 0x12c   :  { %v1182_v62 = vld [vmem:[#allocation3 + $0x20] sm:$0xff] }
 0x12d   :  { %3016 = vtanh.f32 %v3413_v63  ;;  %v3462_v0 = vpack.c.bf16 %v1182_v62, %v1178_v61  ;;  %v1441_v61 = vld [vmem:[#allocation3 + $0xe8] sm:$0xff]  ;;  %v1439_v62 = vld [vmem:[#allocation3 + $0xd8] sm:$0xff] }
 0x137   :  { %v3017_v9 = vpop.eup %3016 }
 0x138   :  { %v704_v10 = vmul.f32 %v3017_v9, %v699_v8  ;;  %v1184_v8 = vld [vmem:[#allocation3 + $0x30] sm:$0xff] }
 0x139   :  { %v3465_v9 = vpack.c.bf16 %v1184_v8, %v1180_v7  ;;  %v1443_v8 = vld [vmem:[#allocation3 + $0xf8] sm:$0xff] }
 0x13a   :  { %705 = vst [vmem:[#allocation9] sm:$0xff] %v704_v10  ;;  %839 = vmatmul.mubr.f32.vlgmr.msra.gmra.mrb[2].mxu0 %v704_v10  ;;  %910 = vmatmul.mubr.f32.vlgmr.msra.gmra.mrb[2].mxu1 %v704_v10  ;;  %v1187_v10 = vld [vmem:[#allocation3 + $0x48] sm:$0xff] }
 0x13b   :  { %2558 = vmatpush1.bf16.msra.mxu0 %v3223_v25  ;;  %2590 = vmatpush1.bf16.msra.mxu1 %v3225_v26 }
 0x13c   :  { %2560 = vmatprep.subr.bf16.mxu0 %v3231_v30  ;;  %2592 = vmatprep.subr.bf16.mxu1 %v3235_v34 }
 0x13d   :  { %1072 = vmatprep.mubr.f32.mxu0 %v3141_v13  ;;  %1143 = vmatprep.mubr.f32.mxu1 %v3141_v13 }
 0x13f   :  { %2562 = vmatpush1.bf16.msra.mxu0 %v3239_v38  ;;  %2594 = vmatpush1.bf16.msra.mxu1 %v3241_v39 }
 0x140   :  { %2564 = vmatprep.subr.bf16.mxu0 %v3248_v43  ;;  %2596 = vmatprep.subr.bf16.mxu1 %v3252_v47 }
 0x143   :  { %2566 = vmatpush1.bf16.msra.mxu0 %v3256_v51  ;;  %2598 = vmatpush1.bf16.msra.mxu1 %v3258_v52 }
 0x144   :  { %2568 = vmatprep.subr.bf16.mxu0 %v3267_v59  ;;  %2600 = vmatprep.subr.bf16.mxu1 %v3269_v60 }
 0x147   :  { %2570 = vmatpush1.bf16.msra.mxu0 %v3275_v2  ;;  %2602 = vmatpush1.bf16.msra.mxu1 %v3277_v3 }
 0x148   :  { %2572 = vmatprep.subr.bf16.mxu0 %v3286_v11  ;;  %2604 = vmatprep.subr.bf16.mxu1 %v3288_v12 }
 0x14b   :  { %2574 = vmatpush1.bf16.msra.mxu0 %v3294_v19  ;;  %2606 = vmatpush1.bf16.msra.mxu1 %v3296_v20 }
 0x14c   :  { %2576 = vmatprep.subr.bf16.mxu0 %v3305_v29  ;;  %2608 = vmatprep.subr.bf16.mxu1 %v3307_v31 }
 0x14f   :  { %2578 = vmatpush1.bf16.msra.mxu0 %v3313_v37  ;;  %2610 = vmatpush1.bf16.msra.mxu1 %v3315_v40 }
 0x150   :  { %2580 = vmatprep.subr.bf16.mxu0 %v3324_v48  ;;  %2612 = vmatprep.subr.bf16.mxu1 %v3326_v49 }
 0x153   :  { %2582 = vmatpush1.bf16.msra.mxu0 %v3332_v56  ;;  %2614 = vmatpush1.bf16.msra.mxu1 %v3334_v57 }
 0x154   :  { %2584 = vmatprep.subr.bf16.mxu0 %v3343_v1  ;;  %2616 = vmatprep.subr.bf16.mxu1 %v3345_v4 }
 0x157   :  { %2586 = vmatpush1.bf16.msra.mxu0 %v3351_v5  ;;  %2618 = vmatpush1.bf16.msra.mxu1 %v3353_v6 }
 0x158   :  { %2620 = vmatprep.subr.bf16.mxu0 %v3458_v55 }
 0x20d   :  { %v840_v25 = vpop.f32.mrb[2].mxu0  ;;  %v911_v26 = vpop.f32.mrb[2].mxu1 }
 0x20e   :  { %v2941_v30 = vadd.f32 %v840_v25, %v3401_v15  ;;  %v842_v34 = vpop.f32.mrb[3].mxu0  ;;  %v913_v38 = vpop.f32.mrb[3].mxu1  ;;  %v2957_v51 = vadd.f32 %v911_v26, %v3406_v27  ;;  %v1191_v25 = vld [vmem:[#allocation3 + $0x68] sm:$0xff]  ;;  %v1189_v26 = vld [vmem:[#allocation3 + $0x58] sm:$0xff] }
 0x20f   :  { %v2942_v39 = vadd.f32 %v842_v34, %v3403_v18  ;;  %v2958_v52 = vadd.f32 %v913_v38, %v3410_v41  ;;  %v1193_v34 = vld [vmem:[#allocation3 + $0x78] sm:$0xff]  ;;  %v1186_v38 = vld [vmem:[#allocation3 + $0x40] sm:$0xff] }
 0x210   :  { %v920_v43 = vmul.f32 0.5, %v2941_v30  ;;  %v3470_v30 = vpack.c.bf16 %v1191_v25, %v1187_v10  ;;  %v1436_v10 = vld [vmem:[#allocation3 + $0xc0] sm:$0xff] }
 0x211   :  { %v924_v47 = vmul.f32 0.5, %v2942_v39  ;;  %v929_v14 = vmul.f32 0.5, %v2958_v52  ;;  %v1190_v39 = vld [vmem:[#allocation3 + $0x60] sm:$0xff]  ;;  %v1192_v52 = vld [vmem:[#allocation3 + $0x70] sm:$0xff] }
 0x212   :  { %3018 = vtanh.f32 %v920_v43  ;;  %v3472_v43 = vpack.c.bf16 %v1193_v34, %v1189_v26  ;;  %v1440_v25 = vld [vmem:[#allocation3 + $0xe0] sm:$0xff]  ;;  %v3538_v26 = vpack.c.bf16 %v1443_v8, %v1439_v62  ;;  %v1469_v62 = vld [vmem:[#allocation3 + $0x1c8] sm:$0xff] }
 0x213   :  { %3020 = vtanh.f32 %v924_v47  ;;  %v3474_v47 = vpack.c.bf16 %v1190_v39, %v1186_v38  ;;  %v3540_v34 = vpack.c.bf16 %v1440_v25, %v1436_v10  ;;  %v1438_v38 = vld [vmem:[#allocation3 + $0xd0] sm:$0xff]  ;;  %v1473_v8 = vld [vmem:[#allocation3 + $0x1e8] sm:$0xff]  ;;  %v1471_v10 = vld [vmem:[#allocation3 + $0x1d8] sm:$0xff] }
 0x214   :  { %3022 = vtanh.f32 %v2957_v51  ;;  %v1188_v51 = vld [vmem:[#allocation3 + $0x50] sm:$0xff]  ;;  %v3584_v25 = vpack.c.bf16 %v1473_v8, %v1469_v62 }
 0x215   :  { %3024 = vtanh.f32 %v929_v14  ;;  %v3477_v14 = vpack.c.bf16 %v1192_v52, %v1188_v51  ;;  %v1442_v39 = vld [vmem:[#allocation3 + $0xf0] sm:$0xff]  ;;  %v1445_v52 = vld [vmem:[#allocation3 + $0x108] sm:$0xff] }
 0x216   :  { %v3543_v51 = vpack.c.bf16 %v1442_v39, %v1438_v38  ;;  %v1475_v38 = vld [vmem:[#allocation3 + $0x1f8] sm:$0xff]  ;;  %v1468_v39 = vld [vmem:[#allocation3 + $0x1c0] sm:$0xff] }
 0x21c   :  { %v3019_v16 = vpop.eup %3018 }
 0x21d   :  { %v3021_v22 = vpop.eup %3020  ;;  %v922_v23 = vmul.f32 0.5, %v3019_v16  ;;  %v1195_v16 = vld [vmem:[#allocation3 + $0x88] sm:$0xff] }
 0x21e   :  { %v926_v24 = vmul.f32 0.5, %v3021_v22  ;;  %v3023_v17 = vpop.eup %3022  ;;  %v1199_v22 = vld [vmem:[#allocation3 + $0xa8] sm:$0xff] }
 0x21f   :  { %v923_v28 = vadd.f32 0.5, %v922_v23  ;;  %v3025_v36 = vpop.eup %3024  ;;  %v1197_v23 = vld [vmem:[#allocation3 + $0x98] sm:$0xff] }
 0x220   :  { %v927_v32 = vadd.f32 0.5, %v926_v24  ;;  %v931_v42 = vmul.f32 0.5, %v3025_v36  ;;  %v3482_v24 = vpack.c.bf16 %v1199_v22, %v1195_v16  ;;  %v1196_v36 = vld [vmem:[#allocation3 + $0x90] sm:$0xff]  ;;  %v1449_v16 = vld [vmem:[#allocation3 + $0x128] sm:$0xff]  ;;  %v1447_v22 = vld [vmem:[#allocation3 + $0x118] sm:$0xff] }
 0x221   :  { %v934_v21 = vmul.f32 %v3023_v17, %v923_v28  ;;  %v1201_v28 = vld [vmem:[#allocation3 + $0xb8] sm:$0xff]  ;;  %v1194_v17 = vld [vmem:[#allocation3 + $0x80] sm:$0xff] }
 0x222   :  { %v933_v33 = vmul.f32 %v927_v32, %v3413_v63  ;;  %v932_v44 = vadd.f32 0.5, %v931_v42  ;;  %v3460_v63 = vpack.c.bf16 %v1185_v58, %v1181_v54  ;;  %v1198_v32 = vld [vmem:[#allocation3 + $0xa0] sm:$0xff]  ;;  %v1200_v42 = vld [vmem:[#allocation3 + $0xb0] sm:$0xff] }
 0x224   :  { %v3453_v35 = vadd.f32 %v934_v21, %v933_v33  ;;  %2652 = vmatprep.subr.bf16.mxu1 %v3460_v63  ;;  %v3484_v21 = vpack.c.bf16 %v1201_v28, %v1197_v23  ;;  %v3486_v33 = vpack.c.bf16 %v1198_v32, %v1194_v17  ;;  %v3548_v23 = vpack.c.bf16 %v1449_v16, %v1445_v52  ;;  %v1451_v28 = vld [vmem:[#allocation3 + $0x138] sm:$0xff]  ;;  %v1444_v17 = vld [vmem:[#allocation3 + $0x100] sm:$0xff] }
 0x225   :  { %v1448_v32 = vld [vmem:[#allocation3 + $0x120] sm:$0xff]  ;;  %v3586_v16 = vpack.c.bf16 %v1475_v38, %v1471_v10 }
 0x226   :  { %3026 = vtanh.f32 %v3453_v35  ;;  %v1472_v52 = vld [vmem:[#allocation3 + $0x1e0] sm:$0xff] }
 0x230   :  { %v3027_v45 = vpop.eup %3026 }
 0x231   :  { %v937_v46 = vmul.f32 %v3027_v45, %v932_v44  ;;  %v3489_v44 = vpack.c.bf16 %v1200_v42, %v1196_v36  ;;  %v3550_v36 = vpack.c.bf16 %v1451_v28, %v1447_v22  ;;  %v3552_v42 = vpack.c.bf16 %v1448_v32, %v1444_v17  ;;  %v1470_v28 = vld [vmem:[#allocation3 + $0x1d0] sm:$0xff] }
 0x232   :  { %v3588_v22 = vpack.c.bf16 %v1472_v52, %v1468_v39  ;;  %v1474_v17 = vld [vmem:[#allocation3 + $0x1f0] sm:$0xff] }
 0x233   :  { %939 = vst [vmem:[#allocation9 + $0x8] sm:$0xff] %v937_v46  ;;  %1073 = vmatmul.mubr.f32.vlgmr.msra.gmra.mrb[4].mxu0 %v937_v46  ;;  %1144 = vmatmul.mubr.f32.vlgmr.msra.gmra.mrb[4].mxu1 %v937_v46  ;;  %v3591_v32 = vpack.c.bf16 %v1474_v17, %v1470_v28 }
 0x234   :  { %1306 = vmatprep.mubr.f32.mxu0 %v3141_v13  ;;  %1377 = vmatprep.mubr.f32.mxu1 %v3141_v13 }
 0x235   :  { %2622 = vmatpush1.bf16.msra.mxu0 %v3462_v0  ;;  %2654 = vmatpush1.bf16.msra.mxu1 %v3465_v9 }
 0x236   :  { %2624 = vmatprep.subr.bf16.mxu0 %v3470_v30  ;;  %2656 = vmatprep.subr.bf16.mxu1 %v3472_v43 }
 0x239   :  { %2626 = vmatpush1.bf16.msra.mxu0 %v3474_v47  ;;  %2658 = vmatpush1.bf16.msra.mxu1 %v3477_v14 }
 0x23a   :  { %2628 = vmatprep.subr.bf16.mxu0 %v3482_v24  ;;  %2660 = vmatprep.subr.bf16.mxu1 %v3484_v21 }
 0x23d   :  { %2630 = vmatpush1.bf16.msra.mxu0 %v3486_v33  ;;  %2662 = vmatpush1.bf16.msra.mxu1 %v3489_v44 }
 0x23e   :  { %2632 = vmatprep.subr.bf16.mxu0 %v3267_v59  ;;  %2664 = vmatprep.subr.bf16.mxu1 %v3269_v60 }
 0x241   :  { %2634 = vmatpush1.bf16.msra.mxu0 %v3275_v2  ;;  %2666 = vmatpush1.bf16.msra.mxu1 %v3277_v3 }
 0x242   :  { %2636 = vmatprep.subr.bf16.mxu0 %v3286_v11  ;;  %2668 = vmatprep.subr.bf16.mxu1 %v3288_v12 }
 0x245   :  { %2638 = vmatpush1.bf16.msra.mxu0 %v3294_v19  ;;  %2670 = vmatpush1.bf16.msra.mxu1 %v3296_v20 }
 0x246   :  { %2640 = vmatprep.subr.bf16.mxu0 %v3305_v29  ;;  %2672 = vmatprep.subr.bf16.mxu1 %v3307_v31 }
 0x249   :  { %2642 = vmatpush1.bf16.msra.mxu0 %v3313_v37  ;;  %2674 = vmatpush1.bf16.msra.mxu1 %v3315_v40 }
 0x24a   :  { %2644 = vmatprep.subr.bf16.mxu0 %v3324_v48  ;;  %2676 = vmatprep.subr.bf16.mxu1 %v3326_v49 }
 0x24d   :  { %2646 = vmatpush1.bf16.msra.mxu0 %v3332_v56  ;;  %2678 = vmatpush1.bf16.msra.mxu1 %v3334_v57 }
 0x24e   :  { %2648 = vmatprep.subr.bf16.mxu0 %v3343_v1  ;;  %2680 = vmatprep.subr.bf16.mxu1 %v3345_v4 }
 0x251   :  { %2650 = vmatpush1.bf16.msra.mxu0 %v3351_v5  ;;  %2682 = vmatpush1.bf16.msra.mxu1 %v3353_v6 }
 0x252   :  { %2684 = vmatprep.subr.bf16.mxu0 %v3458_v55  ;;  %2716 = vmatprep.subr.bf16.mxu1 %v3460_v63 }
 0x306   :  { %v1074_v59 = vpop.f32.mrb[4].mxu0  ;;  %v1145_v60 = vpop.f32.mrb[4].mxu1 }
 0x307   :  { %v2943_v2 = vadd.f32 %v1074_v59, %v3401_v15  ;;  %v1076_v3 = vpop.f32.mrb[5].mxu0  ;;  %v1147_v11 = vpop.f32.mrb[5].mxu1  ;;  %v2959_v29 = vadd.f32 %v1145_v60, %v3406_v27  ;;  %v1446_v59 = vld [vmem:[#allocation3 + $0x110] sm:$0xff] }
 0x308   :  { %v2944_v12 = vadd.f32 %v1076_v3, %v3403_v18  ;;  %v2960_v31 = vadd.f32 %v1147_v11, %v3410_v41  ;;  %v1450_v60 = vld [vmem:[#allocation3 + $0x130] sm:$0xff]  ;;  %v1453_v3 = vld [vmem:[#allocation3 + $0x148] sm:$0xff] }
 0x309   :  { %v1154_v19 = vmul.f32 0.5, %v2943_v2  ;;  %v3555_v2 = vpack.c.bf16 %v1450_v60, %v1446_v59  ;;  %v1457_v11 = vld [vmem:[#allocation3 + $0x168] sm:$0xff] }
 0x30a   :  { %v1158_v20 = vmul.f32 0.5, %v2944_v12  ;;  %v1163_v37 = vmul.f32 0.5, %v2960_v31  ;;  %v1455_v12 = vld [vmem:[#allocation3 + $0x158] sm:$0xff]  ;;  %v1456_v31 = vld [vmem:[#allocation3 + $0x160] sm:$0xff] }
 0x30b   :  { %3028 = vtanh.f32 %v1154_v19  ;;  %v3560_v19 = vpack.c.bf16 %v1457_v11, %v1453_v3 }
 0x30c   :  { %3030 = vtanh.f32 %v1158_v20  ;;  %v1459_v20 = vld [vmem:[#allocation3 + $0x178] sm:$0xff] }
 0x30d   :  { %3032 = vtanh.f32 %v2959_v29  ;;  %v1452_v29 = vld [vmem:[#allocation3 + $0x140] sm:$0xff] }
 0x30e   :  { %3034 = vtanh.f32 %v1163_v37  ;;  %v3562_v37 = vpack.c.bf16 %v1459_v20, %v1455_v12 }
 0x315   :  { %v3029_v40 = vpop.eup %3028 }
 0x316   :  { %v3031_v48 = vpop.eup %3030  ;;  %v1156_v49 = vmul.f32 0.5, %v3029_v40  ;;  %v3564_v40 = vpack.c.bf16 %v1456_v31, %v1452_v29 }
 0x317   :  { %v1160_v56 = vmul.f32 0.5, %v3031_v48  ;;  %v3033_v1 = vpop.eup %3032  ;;  %v1454_v48 = vld [vmem:[#allocation3 + $0x150] sm:$0xff] }
 0x318   :  { %v1157_v57 = vadd.f32 0.5, %v1156_v49  ;;  %v3035_v46 = vpop.eup %3034  ;;  %v1458_v49 = vld [vmem:[#allocation3 + $0x170] sm:$0xff] }
 0x319   :  { %v1161_v4 = vadd.f32 0.5, %v1160_v56  ;;  %v1165_v50 = vmul.f32 0.5, %v3035_v46  ;;  %v3567_v56 = vpack.c.bf16 %v1458_v49, %v1454_v48  ;;  %v1460_v46 = vld [vmem:[#allocation3 + $0x180] sm:$0xff] }
 0x31a   :  { %v1168_v5 = vmul.f32 %v3033_v1, %v1157_v57  ;;  %v1461_v57 = vld [vmem:[#allocation3 + $0x188] sm:$0xff] }
 0x31b   :  { %v1167_v6 = vmul.f32 %v1161_v4, %v3453_v35  ;;  %v1166_v53 = vadd.f32 0.5, %v1165_v50  ;;  %v1437_v35 = vld [vmem:[#allocation3 + $0xc8] sm:$0xff]  ;;  %v1463_v4 = vld [vmem:[#allocation3 + $0x198] sm:$0xff]  ;;  %v1464_v50 = vld [vmem:[#allocation3 + $0x1a0] sm:$0xff] }
 0x31c   :  { %v3536_v7 = vpack.c.bf16 %v1441_v61, %v1437_v35  ;;  %v1465_v1 = vld [vmem:[#allocation3 + $0x1a8] sm:$0xff]  ;;  %v1466_v35 = vld [vmem:[#allocation3 + $0x1b0] sm:$0xff] }
 0x31d   :  { %v3521_v45 = vadd.f32 %v1168_v5, %v1167_v6  ;;  %v3572_v5 = vpack.c.bf16 %v1465_v1, %v1461_v57  ;;  %v1467_v6 = vld [vmem:[#allocation3 + $0x1b8] sm:$0xff] }
 0x31f   :  { %3036 = vtanh.f32 %v3521_v45 }
 0x329   :  { %v3037_v54 = vpop.eup %3036 }
 0x32a   :  { %v1171_v58 = vmul.f32 %v3037_v54, %v1166_v53  ;;  %v3574_v53 = vpack.c.bf16 %v1467_v6, %v1463_v4  ;;  %v3576_v54 = vpack.c.bf16 %v1464_v50, %v1460_v46 }
 0x32c   :  { %1173 = vst [vmem:[#allocation9 + $0x10] sm:$0xff] %v1171_v58  ;;  %1307 = vmatmul.mubr.f32.vlgmr.msra.gmra.mrb[6].mxu0 %v1171_v58  ;;  %1378 = vmatmul.mubr.f32.vlgmr.msra.gmra.mrb[6].mxu1 %v1171_v58  ;;  %v1462_v58 = vld [vmem:[#allocation3 + $0x190] sm:$0xff] }
 0x32d   :  { %2686 = vmatpush1.bf16.msra.mxu0 %v3462_v0  ;;  %2718 = vmatpush1.bf16.msra.mxu1 %v3465_v9  ;;  %v3579_v61 = vpack.c.bf16 %v1466_v35, %v1462_v58 }
 0x32e   :  { %2688 = vmatprep.subr.bf16.mxu0 %v3470_v30  ;;  %2720 = vmatprep.subr.bf16.mxu1 %v3472_v43 }
 0x32f   :  { %1540 = vmatprep.mubr.f32.mxu0 %v3141_v13  ;;  %1611 = vmatprep.mubr.f32.mxu1 %v3141_v13 }
 0x331   :  { %2690 = vmatpush1.bf16.msra.mxu0 %v3474_v47  ;;  %2722 = vmatpush1.bf16.msra.mxu1 %v3477_v14 }
 0x332   :  { %2692 = vmatprep.subr.bf16.mxu0 %v3482_v24  ;;  %2724 = vmatprep.subr.bf16.mxu1 %v3484_v21 }
 0x335   :  { %2694 = vmatpush1.bf16.msra.mxu0 %v3486_v33  ;;  %2726 = vmatpush1.bf16.msra.mxu1 %v3489_v44 }
 0x336   :  { %2696 = vmatprep.subr.bf16.mxu0 %v3536_v7  ;;  %2728 = vmatprep.subr.bf16.mxu1 %v3538_v26 }
 0x339   :  { %2698 = vmatpush1.bf16.msra.mxu0 %v3540_v34  ;;  %2730 = vmatpush1.bf16.msra.mxu1 %v3543_v51 }
 0x33a   :  { %2700 = vmatprep.subr.bf16.mxu0 %v3548_v23  ;;  %2732 = vmatprep.subr.bf16.mxu1 %v3550_v36 }
 0x33d   :  { %2702 = vmatpush1.bf16.msra.mxu0 %v3552_v42  ;;  %2734 = vmatpush1.bf16.msra.mxu1 %v3555_v2 }
 0x33e   :  { %2704 = vmatprep.subr.bf16.mxu0 %v3560_v19  ;;  %2736 = vmatprep.subr.bf16.mxu1 %v3562_v37 }
 0x341   :  { %2706 = vmatpush1.bf16.msra.mxu0 %v3564_v40  ;;  %2738 = vmatpush1.bf16.msra.mxu1 %v3567_v56 }
 0x342   :  { %2708 = vmatprep.subr.bf16.mxu0 %v3572_v5  ;;  %2740 = vmatprep.subr.bf16.mxu1 %v3574_v53 }
 0x345   :  { %2710 = vmatpush1.bf16.msra.mxu0 %v3576_v54  ;;  %2742 = vmatpush1.bf16.msra.mxu1 %v3579_v61 }
 0x346   :  { %2712 = vmatprep.subr.bf16.mxu0 %v3584_v25  ;;  %2744 = vmatprep.subr.bf16.mxu1 %v3586_v16 }
 0x349   :  { %2714 = vmatpush1.bf16.msra.mxu0 %v3588_v22  ;;  %2746 = vmatpush1.bf16.msra.mxu1 %v3591_v32 }
 0x34a   :  { %2748 = vmatprep.subr.bf16.mxu0 %v3458_v55  ;;  %2780 = vmatprep.subr.bf16.mxu1 %v3460_v63 }
 0x3ff   :  { %v1308_v59 = vpop.f32.mrb[6].mxu0  ;;  %v1379_v60 = vpop.f32.mrb[6].mxu1 }
 0x400   :  { %v2945_v3 = vadd.f32 %v1308_v59, %v3401_v15  ;;  %v1310_v11 = vpop.f32.mrb[7].mxu0  ;;  %v1381_v12 = vpop.f32.mrb[7].mxu1  ;;  %v2961_v48 = vadd.f32 %v1379_v60, %v3406_v27 }
 0x401   :  { %v2946_v20 = vadd.f32 %v1310_v11, %v3403_v18  ;;  %v2962_v49 = vadd.f32 %v1381_v12, %v3410_v41 }
 0x402   :  { %v1388_v29 = vmul.f32 0.5, %v2945_v3 }
 0x403   :  { %v1392_v31 = vmul.f32 0.5, %v2946_v20  ;;  %v1397_v57 = vmul.f32 0.5, %v2962_v49 }
 0x404   :  { %3038 = vtanh.f32 %v1388_v29 }
 0x405   :  { %3040 = vtanh.f32 %v1392_v31 }
 0x406   :  { %3042 = vtanh.f32 %v2961_v48 }
 0x407   :  { %3044 = vtanh.f32 %v1397_v57 }
 0x40e   :  { %v3039_v1 = vpop.eup %3038 }
 0x40f   :  { %v3041_v4 = vpop.eup %3040  ;;  %v1390_v6 = vmul.f32 0.5, %v3039_v1 }
 0x410   :  { %v1394_v46 = vmul.f32 0.5, %v3041_v4  ;;  %v3043_v58 = vpop.eup %3042 }
 0x411   :  { %v1391_v50 = vadd.f32 0.5, %v1390_v6  ;;  %v3045_v38 = vpop.eup %3044 }
 0x412   :  { %v1395_v35 = vadd.f32 0.5, %v1394_v46  ;;  %v1399_v39 = vmul.f32 0.5, %v3045_v38 }
 0x413   :  { %v1402_v62 = vmul.f32 %v3043_v58, %v1391_v50 }
 0x414   :  { %v1401_v8 = vmul.f32 %v1395_v35, %v3521_v45  ;;  %v1400_v52 = vadd.f32 0.5, %v1399_v39 }
 0x416   :  { %v3603_v10 = vadd.f32 %v1402_v62, %v1401_v8 }
 0x418   :  { %3046 = vtanh.f32 %v3603_v10 }
 0x422   :  { %v3047_v28 = vpop.eup %3046 }
 0x423   :  { %v1405_v17 = vmul.f32 %v3047_v28, %v1400_v52 }
 0x425   :  { %1407 = vst [vmem:[#allocation9 + $0x18] sm:$0xff] %v1405_v17  ;;  %1541 = vmatmul.mubr.f32.vlgmr.msra.gmra.mrb[8].mxu0 %v1405_v17  ;;  %1612 = vmatmul.mubr.f32.vlgmr.msra.gmra.mrb[8].mxu1 %v1405_v17 }
 0x426   :  { %2750 = vmatpush1.bf16.msra.mxu0 %v3462_v0  ;;  %2782 = vmatpush1.bf16.msra.mxu1 %v3465_v9 }
 0x427   :  { %2752 = vmatprep.subr.bf16.mxu0 %v3470_v30  ;;  %2784 = vmatprep.subr.bf16.mxu1 %v3472_v43 }
 0x428   :  { %1774 = vmatprep.mubr.f32.mxu0 %v3141_v13  ;;  %1845 = vmatprep.mubr.f32.mxu1 %v3141_v13 }
 0x42a   :  { %2754 = vmatpush1.bf16.msra.mxu0 %v3474_v47  ;;  %2786 = vmatpush1.bf16.msra.mxu1 %v3477_v14 }
 0x42b   :  { %2756 = vmatprep.subr.bf16.mxu0 %v3482_v24  ;;  %2788 = vmatprep.subr.bf16.mxu1 %v3484_v21 }
 0x42e   :  { %2758 = vmatpush1.bf16.msra.mxu0 %v3486_v33  ;;  %2790 = vmatpush1.bf16.msra.mxu1 %v3489_v44 }
 0x42f   :  { %2760 = vmatprep.subr.bf16.mxu0 %v3536_v7  ;;  %2792 = vmatprep.subr.bf16.mxu1 %v3538_v26 }
 0x432   :  { %2762 = vmatpush1.bf16.msra.mxu0 %v3540_v34  ;;  %2794 = vmatpush1.bf16.msra.mxu1 %v3543_v51 }
 0x433   :  { %2764 = vmatprep.subr.bf16.mxu0 %v3548_v23  ;;  %2796 = vmatprep.subr.bf16.mxu1 %v3550_v36 }
 0x436   :  { %2766 = vmatpush1.bf16.msra.mxu0 %v3552_v42  ;;  %2798 = vmatpush1.bf16.msra.mxu1 %v3555_v2 }
 0x437   :  { %2768 = vmatprep.subr.bf16.mxu0 %v3560_v19  ;;  %2800 = vmatprep.subr.bf16.mxu1 %v3562_v37 }
 0x43a   :  { %2770 = vmatpush1.bf16.msra.mxu0 %v3564_v40  ;;  %2802 = vmatpush1.bf16.msra.mxu1 %v3567_v56 }
 0x43b   :  { %2772 = vmatprep.subr.bf16.mxu0 %v3572_v5  ;;  %2804 = vmatprep.subr.bf16.mxu1 %v3574_v53 }
 0x43e   :  { %2774 = vmatpush1.bf16.msra.mxu0 %v3576_v54  ;;  %2806 = vmatpush1.bf16.msra.mxu1 %v3579_v61 }
 0x43f   :  { %2776 = vmatprep.subr.bf16.mxu0 %v3584_v25  ;;  %2808 = vmatprep.subr.bf16.mxu1 %v3586_v16 }
 0x442   :  { %2778 = vmatpush1.bf16.msra.mxu0 %v3588_v22  ;;  %2810 = vmatpush1.bf16.msra.mxu1 %v3591_v32 }
 0x443   :  { %2812 = vmatprep.subr.bf16.mxu0 %v3458_v55  ;;  %2844 = vmatprep.subr.bf16.mxu1 %v3460_v63 }
 0x4f8   :  { %v1542_v45 = vpop.f32.mrb[8].mxu0  ;;  %v1613_v59 = vpop.f32.mrb[8].mxu1 }
 0x4f9   :  { %v2947_v60 = vadd.f32 %v1542_v45, %v3401_v15  ;;  %v1544_v3 = vpop.f32.mrb[9].mxu0  ;;  %v1615_v11 = vpop.f32.mrb[9].mxu1  ;;  %v2963_v31 = vadd.f32 %v1613_v59, %v3406_v27 }
 0x4fa   :  { %v2948_v12 = vadd.f32 %v1544_v3, %v3403_v18  ;;  %v2964_v48 = vadd.f32 %v1615_v11, %v3410_v41 }
 0x4fb   :  { %v1622_v20 = vmul.f32 0.5, %v2947_v60 }
 0x4fc   :  { %v1626_v29 = vmul.f32 0.5, %v2948_v12  ;;  %v1631_v55 = vmul.f32 0.5, %v2964_v48 }
 0x4fd   :  { %3048 = vtanh.f32 %v1622_v20 }
 0x4fe   :  { %3050 = vtanh.f32 %v1626_v29 }
 0x4ff   :  { %3052 = vtanh.f32 %v2963_v31 }
 0x500   :  { %3054 = vtanh.f32 %v1631_v55 }
 0x507   :  { %v3049_v49 = vpop.eup %3048 }
 0x508   :  { %v3051_v63 = vpop.eup %3050  ;;  %v1624_v57 = vmul.f32 0.5, %v3049_v49 }
 0x509   :  { %v1628_v1 = vmul.f32 0.5, %v3051_v63  ;;  %v3053_v6 = vpop.eup %3052 }
 0x50a   :  { %v1625_v4 = vadd.f32 0.5, %v1624_v57  ;;  %v3055_v62 = vpop.eup %3054  ;;  %v2115_v57 = vld [vmem:[#allocation3 + $0x8] sm:$0xff] }
 0x50b   :  { %v1629_v46 = vadd.f32 0.5, %v1628_v1  ;;  %v1633_v8 = vmul.f32 0.5, %v3055_v62  ;;  %v2119_v1 = vld [vmem:[#allocation3 + $0x28] sm:$0xff] }
 0x50c   :  { %v1636_v50 = vmul.f32 %v3053_v6, %v1625_v4  ;;  %v2117_v4 = vld [vmem:[#allocation3 + $0x18] sm:$0xff]  ;;  %v2875_v6 = vpack.c.bf16 %v2119_v1, %v2115_v57 }
 0x50d   :  { %v1635_v58 = vmul.f32 %v1629_v46, %v3603_v10  ;;  %v1634_v38 = vadd.f32 0.5, %v1633_v8  ;;  %v2121_v46 = vld [vmem:[#allocation3 + $0x38] sm:$0xff]  ;;  %v2116_v8 = vld [vmem:[#allocation3 + $0x10] sm:$0xff] }
 0x50f   :  { %v3645_v35 = vadd.f32 %v1636_v50, %v1635_v58  ;;  %v2114_v50 = vld [vmem:[#allocation3] sm:$0xff] }
 0x510   :  { %v2118_v58 = vld [vmem:[#allocation3 + $0x20] sm:$0xff] }
 0x511   :  { %3056 = vtanh.f32 %v3645_v35  ;;  %v2877_v62 = vpack.c.bf16 %v2118_v58, %v2114_v50 }
 0x51b   :  { %v3057_v39 = vpop.eup %3056 }
 0x51c   :  { %v1639_v52 = vmul.f32 %v3057_v39, %v1634_v38  ;;  %v2120_v38 = vld [vmem:[#allocation3 + $0x30] sm:$0xff] }
 0x51d   :  { %v2909_v39 = vpack.c.bf16 %v2120_v38, %v2116_v8 }
 0x51e   :  { %1641 = vst [vmem:[#allocation9 + $0x20] sm:$0xff] %v1639_v52  ;;  %1775 = vmatmul.mubr.f32.vlgmr.msra.gmra.mrb[10].mxu0 %v1639_v52  ;;  %1846 = vmatmul.mubr.f32.vlgmr.msra.gmra.mrb[10].mxu1 %v1639_v52  ;;  %v2123_v52 = vld [vmem:[#allocation3 + $0x48] sm:$0xff] }
 0x51f   :  { %2814 = vmatpush1.bf16.msra.mxu0 %v3462_v0  ;;  %2846 = vmatpush1.bf16.msra.mxu1 %v3465_v9 }
 0x520   :  { %2816 = vmatprep.subr.bf16.mxu0 %v3470_v30  ;;  %2848 = vmatprep.subr.bf16.mxu1 %v3472_v43 }
 0x521   :  { %2008 = vmatprep.mubr.f32.mxu0 %v3141_v13  ;;  %2079 = vmatprep.mubr.f32.mxu1 %v3141_v13 }
 0x523   :  { %2818 = vmatpush1.bf16.msra.mxu0 %v3474_v47  ;;  %2850 = vmatpush1.bf16.msra.mxu1 %v3477_v14 }
 0x524   :  { %2820 = vmatprep.subr.bf16.mxu0 %v3482_v24  ;;  %2852 = vmatprep.subr.bf16.mxu1 %v3484_v21 }
 0x527   :  { %2822 = vmatpush1.bf16.msra.mxu0 %v3486_v33  ;;  %2854 = vmatpush1.bf16.msra.mxu1 %v3489_v44 }
 0x528   :  { %2824 = vmatprep.subr.bf16.mxu0 %v3536_v7  ;;  %2856 = vmatprep.subr.bf16.mxu1 %v3538_v26 }
 0x52b   :  { %2826 = vmatpush1.bf16.msra.mxu0 %v3540_v34  ;;  %2858 = vmatpush1.bf16.msra.mxu1 %v3543_v51 }
 0x52c   :  { %2828 = vmatprep.subr.bf16.mxu0 %v3548_v23  ;;  %2860 = vmatprep.subr.bf16.mxu1 %v3550_v36 }
 0x52f   :  { %2830 = vmatpush1.bf16.msra.mxu0 %v3552_v42  ;;  %2862 = vmatpush1.bf16.msra.mxu1 %v3555_v2 }
 0x530   :  { %2832 = vmatprep.subr.bf16.mxu0 %v3560_v19  ;;  %2864 = vmatprep.subr.bf16.mxu1 %v3562_v37 }
 0x533   :  { %2834 = vmatpush1.bf16.msra.mxu0 %v3564_v40  ;;  %2866 = vmatpush1.bf16.msra.mxu1 %v3567_v56 }
 0x534   :  { %2836 = vmatprep.subr.bf16.mxu0 %v3572_v5  ;;  %2868 = vmatprep.subr.bf16.mxu1 %v3574_v53 }
 0x537   :  { %2838 = vmatpush1.bf16.msra.mxu0 %v3576_v54  ;;  %2870 = vmatpush1.bf16.msra.mxu1 %v3579_v61 }
 0x538   :  { %2840 = vmatprep.subr.bf16.mxu0 %v3584_v25  ;;  %2872 = vmatprep.subr.bf16.mxu1 %v3586_v16 }
 0x53b   :  { %2842 = vmatpush1.bf16.msra.mxu0 %v3588_v22  ;;  %2874 = vmatpush1.bf16.msra.mxu1 %v3591_v32 }
 0x53c   :  { %2876 = vmatprep.subr.bf16.mxu0 %v2875_v6 }
 0x5f1   :  { %v1776_v0 = vpop.f32.mrb[10].mxu0  ;;  %v1847_v9 = vpop.f32.mrb[10].mxu1 }
 0x5f2   :  { %v2949_v30 = vadd.f32 %v1776_v0, %v3401_v15  ;;  %v1778_v43 = vpop.f32.mrb[11].mxu0  ;;  %v1849_v47 = vpop.f32.mrb[11].mxu1  ;;  %v2965_v33 = vadd.f32 %v1847_v9, %v3406_v27  ;;  %v2127_v0 = vld [vmem:[#allocation3 + $0x68] sm:$0xff]  ;;  %v2125_v9 = vld [vmem:[#allocation3 + $0x58] sm:$0xff] }
 0x5f3   :  { %v2950_v14 = vadd.f32 %v1778_v43, %v3403_v18  ;;  %v2966_v44 = vadd.f32 %v1849_v47, %v3410_v41  ;;  %v2122_v43 = vld [vmem:[#allocation3 + $0x40] sm:$0xff] }
 0x5f4   :  { %v1856_v24 = vmul.f32 0.5, %v2949_v30  ;;  %v2129_v30 = vld [vmem:[#allocation3 + $0x78] sm:$0xff]  ;;  %v2126_v47 = vld [vmem:[#allocation3 + $0x60] sm:$0xff] }
 0x5f5   :  { %v1860_v21 = vmul.f32 0.5, %v2950_v14  ;;  %v1865_v10 = vmul.f32 0.5, %v2966_v44  ;;  %v2911_v14 = vpack.c.bf16 %v2129_v30, %v2125_v9 }
 0x5f6   :  { %3058 = vtanh.f32 %v1856_v24  ;;  %v2881_v24 = vpack.c.bf16 %v2126_v47, %v2122_v43 }
 0x5f7   :  { %3060 = vtanh.f32 %v1860_v21  ;;  %v2124_v21 = vld [vmem:[#allocation3 + $0x50] sm:$0xff] }
 0x5f8   :  { %3062 = vtanh.f32 %v2965_v33  ;;  %v2128_v33 = vld [vmem:[#allocation3 + $0x70] sm:$0xff] }
 0x5f9   :  { %3064 = vtanh.f32 %v1865_v10  ;;  %v2913_v44 = vpack.c.bf16 %v2128_v33, %v2124_v21  ;;  %v2131_v10 = vld [vmem:[#allocation3 + $0x88] sm:$0xff] }
 0x600   :  { %v3059_v28 = vpop.eup %3058 }
 0x601   :  { %v3061_v17 = vpop.eup %3060  ;;  %v1858_v45 = vmul.f32 0.5, %v3059_v28  ;;  %v2135_v28 = vld [vmem:[#allocation3 + $0xa8] sm:$0xff] }
 0x602   :  { %v1862_v59 = vmul.f32 0.5, %v3061_v17  ;;  %v3063_v3 = vpop.eup %3062  ;;  %v2133_v17 = vld [vmem:[#allocation3 + $0x98] sm:$0xff] }
 0x603   :  { %v1859_v60 = vadd.f32 0.5, %v1858_v45  ;;  %v3065_v31 = vpop.eup %3064  ;;  %v2883_v45 = vpack.c.bf16 %v2135_v28, %v2131_v10 }
 0x604   :  { %v1863_v11 = vadd.f32 0.5, %v1862_v59  ;;  %v1867_v48 = vmul.f32 0.5, %v3065_v31  ;;  %v2137_v59 = vld [vmem:[#allocation3 + $0xb8] sm:$0xff]  ;;  %v2136_v31 = vld [vmem:[#allocation3 + $0xb0] sm:$0xff] }
 0x605   :  { %v1870_v12 = vmul.f32 %v3063_v3, %v1859_v60  ;;  %v2130_v60 = vld [vmem:[#allocation3 + $0x80] sm:$0xff] }
 0x606   :  { %v1869_v20 = vmul.f32 %v1863_v11, %v3645_v35  ;;  %v1868_v55 = vadd.f32 0.5, %v1867_v48  ;;  %v2907_v35 = vpack.c.bf16 %v2121_v46, %v2117_v4  ;;  %v2134_v3 = vld [vmem:[#allocation3 + $0xa0] sm:$0xff]  ;;  %v2915_v11 = vpack.c.bf16 %v2137_v59, %v2133_v17 }
 0x608   :  { %v3685_v29 = vadd.f32 %v1870_v12, %v1869_v20  ;;  %2908 = vmatprep.subr.bf16.mxu1 %v2907_v35  ;;  %v2885_v12 = vpack.c.bf16 %v2134_v3, %v2130_v60  ;;  %v2132_v20 = vld [vmem:[#allocation3 + $0x90] sm:$0xff] }
 0x609   :  { %v2917_v48 = vpack.c.bf16 %v2136_v31, %v2132_v20 }
 0x60a   :  { %3066 = vtanh.f32 %v3685_v29 }
 0x614   :  { %v3067_v49 = vpop.eup %3066 }
 0x615   :  { %v1873_v63 = vmul.f32 %v3067_v49, %v1868_v55 }
 0x617   :  { %1875 = vst [vmem:[#allocation9 + $0x28] sm:$0xff] %v1873_v63  ;;  %2009 = vmatmul.mubr.f32.vlgmr.msra.gmra.mrb[12].mxu0 %v1873_v63  ;;  %2080 = vmatmul.mubr.f32.vlgmr.msra.gmra.mrb[12].mxu1 %v1873_v63 }
 0x618   :  { %2242 = vmatprep.mubr.f32.mxu0 %v3141_v13  ;;  %2313 = vmatprep.mubr.f32.mxu1 %v3141_v13  ;;  %v2879_v13 = vpack.c.bf16 %v2127_v0, %v2123_v52 }
 0x619   :  { %2878 = vmatpush1.bf16.msra.mxu0 %v2877_v62  ;;  %2910 = vmatpush1.bf16.msra.mxu1 %v2909_v39 }
 0x61a   :  { %2880 = vmatprep.subr.bf16.mxu0 %v2879_v13  ;;  %2912 = vmatprep.subr.bf16.mxu1 %v2911_v14 }
 0x61d   :  { %2882 = vmatpush1.bf16.msra.mxu0 %v2881_v24  ;;  %2914 = vmatpush1.bf16.msra.mxu1 %v2913_v44 }
 0x61e   :  { %2884 = vmatprep.subr.bf16.mxu0 %v2883_v45  ;;  %2916 = vmatprep.subr.bf16.mxu1 %v2915_v11 }
 0x621   :  { %2886 = vmatpush1.bf16.msra.mxu0 %v2885_v12  ;;  %2918 = vmatpush1.bf16.msra.mxu1 %v2917_v48 }
 0x622   :  { %2888 = vmatprep.subr.bf16.mxu0 %v3536_v7  ;;  %2920 = vmatprep.subr.bf16.mxu1 %v3538_v26 }
 0x625   :  { %2890 = vmatpush1.bf16.msra.mxu0 %v3540_v34  ;;  %2922 = vmatpush1.bf16.msra.mxu1 %v3543_v51 }
 0x626   :  { %2892 = vmatprep.subr.bf16.mxu0 %v3548_v23  ;;  %2924 = vmatprep.subr.bf16.mxu1 %v3550_v36 }
 0x629   :  { %2894 = vmatpush1.bf16.msra.mxu0 %v3552_v42  ;;  %2926 = vmatpush1.bf16.msra.mxu1 %v3555_v2 }
 0x62a   :  { %2896 = vmatprep.subr.bf16.mxu0 %v3560_v19  ;;  %2928 = vmatprep.subr.bf16.mxu1 %v3562_v37 }
 0x62d   :  { %2898 = vmatpush1.bf16.msra.mxu0 %v3564_v40  ;;  %2930 = vmatpush1.bf16.msra.mxu1 %v3567_v56 }
 0x62e   :  { %2900 = vmatprep.subr.bf16.mxu0 %v3572_v5  ;;  %2932 = vmatprep.subr.bf16.mxu1 %v3574_v53 }
 0x631   :  { %2902 = vmatpush1.bf16.msra.mxu0 %v3576_v54  ;;  %2934 = vmatpush1.bf16.msra.mxu1 %v3579_v61 }
 0x632   :  { %2904 = vmatprep.subr.bf16.mxu0 %v3584_v25  ;;  %2936 = vmatprep.subr.bf16.mxu1 %v3586_v16 }
 0x635   :  { %2906 = vmatpush1.bf16.msra.mxu0 %v3588_v22  ;;  %2938 = vmatpush1.bf16.msra.mxu1 %v3591_v32 }
 0x6ea   :  { %v2010_v7 = vpop.f32.mrb[12].mxu0  ;;  %v2081_v26 = vpop.f32.mrb[12].mxu1 }
 0x6eb   :  { %v2951_v34 = vadd.f32 %v2010_v7, %v3401_v15  ;;  %v2012_v51 = vpop.f32.mrb[13].mxu0  ;;  %v2083_v23 = vpop.f32.mrb[13].mxu1  ;;  %v2967_v19 = vadd.f32 %v2081_v26, %v3406_v27 }
 0x6ec   :  { %v2952_v36 = vadd.f32 %v2012_v51, %v3403_v18  ;;  %v2968_v37 = vadd.f32 %v2083_v23, %v3410_v41 }
 0x6ed   :  { %v2090_v42 = vmul.f32 0.5, %v2951_v34 }
 0x6ee   :  { %v2094_v2 = vmul.f32 0.5, %v2952_v36  ;;  %v2099_v40 = vmul.f32 0.5, %v2968_v37 }
 0x6ef   :  { %3068 = vtanh.f32 %v2090_v42 }
 0x6f0   :  { %3070 = vtanh.f32 %v2094_v2 }
 0x6f1   :  { %3072 = vtanh.f32 %v2967_v19 }
 0x6f2   :  { %3074 = vtanh.f32 %v2099_v40 }
 0x6f9   :  { %v3069_v56 = vpop.eup %3068 }
 0x6fa   :  { %v3071_v5 = vpop.eup %3070  ;;  %v2092_v53 = vmul.f32 0.5, %v3069_v56 }
 0x6fb   :  { %v2096_v54 = vmul.f32 0.5, %v3071_v5  ;;  %v3073_v25 = vpop.eup %3072 }
 0x6fc   :  { %v2093_v61 = vadd.f32 0.5, %v2092_v53  ;;  %v3075_v49 = vpop.eup %3074 }
 0x6fd   :  { %v2097_v16 = vadd.f32 0.5, %v2096_v54  ;;  %v2101_v63 = vmul.f32 0.5, %v3075_v49 }
 0x6fe   :  { %v2104_v22 = vmul.f32 %v3073_v25, %v2093_v61 }
 0x6ff   :  { %v2103_v32 = vmul.f32 %v2097_v16, %v3685_v29  ;;  %v2102_v57 = vadd.f32 0.5, %v2101_v63 }
 0x701   :  { %v2105_v55 = vadd.f32 %v2104_v22, %v2103_v32 }
 0x703   :  { %3076 = vtanh.f32 %v2105_v55 }
 0x70d   :  { %v3077_v1 = vpop.eup %3076 }
 0x70e   :  { %v2107_v4 = vmul.f32 %v3077_v1, %v2102_v57 }
 0x710   :  { %2109 = vst [vmem:[#allocation9 + $0x30] sm:$0xff] %v2107_v4  ;;  %2243 = vmatmul.mubr.f32.vlgmr.msra.gmra.mrb[14].mxu0 %v2107_v4  ;;  %2314 = vmatmul.mubr.f32.vlgmr.msra.gmra.mrb[14].mxu1 %v2107_v4 }
 0x7e3   :  { %v2244_v6 = vpop.f32.mrb[14].mxu0  ;;  %v2315_v46 = vpop.f32.mrb[14].mxu1 }
 0x7e4   :  { %v2953_v50 = vadd.f32 %v2244_v6, %v3401_v15  ;;  %v2246_v58 = vpop.f32.mrb[15].mxu0  ;;  %v2317_v35 = vpop.f32.mrb[15].mxu1  ;;  %v2969_v38 = vadd.f32 %v2315_v46, %v3406_v27 }
 0x7e5   :  { %v2954_v62 = vadd.f32 %v2246_v58, %v3403_v18  ;;  %v2970_v39 = vadd.f32 %v2317_v35, %v3410_v41 }
 0x7e6   :  { %v2324_v8 = vmul.f32 0.5, %v2953_v50 }
 0x7e7   :  { %v2328_v29 = vmul.f32 0.5, %v2954_v62  ;;  %v2333_v52 = vmul.f32 0.5, %v2970_v39 }
 0x7e8   :  { %3078 = vtanh.f32 %v2324_v8 }
 0x7e9   :  { %3080 = vtanh.f32 %v2328_v29 }
 0x7ea   :  { %3082 = vtanh.f32 %v2969_v38 }
 0x7eb   :  { %3084 = vtanh.f32 %v2333_v52 }
 0x7f2   :  { %v3079_v0 = vpop.eup %3078 }
 0x7f3   :  { %v3081_v9 = vpop.eup %3080  ;;  %v2326_v13 = vmul.f32 0.5, %v3079_v0 }
 0x7f4   :  { %v2330_v30 = vmul.f32 0.5, %v3081_v9  ;;  %v3083_v43 = vpop.eup %3082 }
 0x7f5   :  { %v2327_v15 = vadd.f32 0.5, %v2326_v13  ;;  %v3085_v21 = vpop.eup %3084 }
 0x7f6   :  { %v2331_v47 = vadd.f32 0.5, %v2330_v30  ;;  %v2335_v33 = vmul.f32 0.5, %v3085_v21 }
 0x7f7   :  { %v2338_v14 = vmul.f32 %v3083_v43, %v2327_v15 }
 0x7f8   :  { %v2337_v18 = vmul.f32 %v2331_v47, %v2105_v55  ;;  %v2336_v27 = vadd.f32 0.5, %v2335_v33 }
 0x7fa   :  { %v2339_v24 = vadd.f32 %v2338_v14, %v2337_v18 }
 0x7fc   :  { %3086 = vtanh.f32 %v2339_v24 }
 0x806   :  { %v3087_v44 = vpop.eup %3086 }
 0x807   :  { %v2341_v41 = vmul.f32 %v3087_v44, %v2336_v27 }
 0x809   :  { %2343 = vst [vmem:[#allocation9 + $0x38] sm:$0xff] %v2341_v41 }
 0x80a   :  { %3121 = shalt.err (!%p3118_p12)
}
 0x80b   :  { %s3122_s10 = scalar_lea.hbm %s3735_s4, 1024 }
 0x80c   :  { %p3123_p13 = scmp.ne.s32.totalorder %s3735_s4, %s3122_s10  ;;  %p3126_p0 = scmp.lt.u32.totalorder %s3122_s10, %s3735_s4 }
 0x80e   :  { %p3128_p1 = pnand %p3126_p0, %p3123_p13 }
 0x810   :  { %3131 = shalt.err (!%p3128_p1)
}
 0x811   :  { %s3143_s15 = smov 128   ;;  %s3144_s1 = smov 8  }
 0x812   :  { %2357 = dma.vmem_to_hbm [thread:$0]  %s2352_s6, 1024, %s3735_s4, [#allocation10], %s3143_s15, %s3143_s15, %s3144_s1  }
 0x813   :  { %3138 = dma.done.wait [#allocation10], 1024  }
 0x814   :  { %3139 = vsyncadd [#allocation10], 4294966272 }
 0x815   :  { %2361 = vsyncpa [#allocation10], 1 }
 0x816   :  { %2362 = vsyncmov [#allocation8] }
 0x819   :  { %s2363_s2 = vpop.sfrf %2362 }
 0x81a   :  { %p2416_p2 = scmp.ne.s32.totalorder %s2363_s2, 0 }
 0x81c   :  { %2367 = shalt.err (%p2416_p2)  }
 0x81d   :  { %2369 = vsyncmov [#allocation8 + $0x1] }
 0x820   :  { %s2370_s17 = vpop.sfrf %2369 }
 0x821   :  { %p2417_p3 = scmp.ne.s32.totalorder %s2370_s17, 0 }
 0x823   :  { %2374 = shalt.err (%p2417_p3)  }
 0x824   :  { %2376 = vsyncmov [#allocation8 + $0x2] }
 0x827   :  { %s2377_s18 = vpop.sfrf %2376 }
 0x828   :  { %p2418_p4 = scmp.ne.s32.totalorder %s2377_s18, 0 }
 0x82a   :  { %2381 = shalt.err (%p2418_p4)  }

</bundles_post_ra>
